<compile_context>
chip_gen: v5e
topology: v5e:2x2
jax: 0.10.0
libtpu: 0.0.40
codegen_flags: <defaults>
</compile_context>

<pallas_src>
import functools
import math

import jax
import jax.numpy as jnp
from jax.experimental import pallas as pl
from jax.experimental.pallas import tpu as pltpu


# TODO(synk): at production shapes set this per generation (budget <= 48 MiB on
# v7x, <= 100 MiB on v5e/v6e); None keeps the compiler's default scoped limit,
# which is ample for the demo shapes.
VMEM_LIMIT_BYTES = None


def _mosaic_params(dims):
    kw = dict(dimension_semantics=dims)
    if VMEM_LIMIT_BYTES is not None:
        kw["vmem_limit_bytes"] = VMEM_LIMIT_BYTES
    return pltpu.CompilerParams(**kw)


def _row_tile(n, cap=512):
    """Largest tile <= cap that evenly divides n (full size if n <= cap)."""
    if n <= cap:
        return n
    for t in range(cap, 0, -1):
        if n % t == 0 and t % 8 == 0:
            return t
    return n


# ----------------------------- Pallas kernels ------------------------------

def _embed_kernel(x_ref, w_ref, b_ref, pe_ref, o_ref):
    # DataEmbedding: value projection + sinusoidal PE (dropout = identity).
    x = x_ref[0].astype(jnp.bfloat16)                        # (TL, d_feat)
    o_ref[0] = (jnp.dot(x, w_ref[...], preferred_element_type=jnp.float32)
                + b_ref[...] + pe_ref[...])


def embed(x, w_bf16, b, pe, *, seq_tile):
    B, L, Din = x.shape
    D = w_bf16.shape[1]
    return pl.pallas_call(
        _embed_kernel,
        out_shape=jax.ShapeDtypeStruct((B, L, D), jnp.float32),
        grid=(B, L // seq_tile),
        in_specs=[
            pl.BlockSpec((1, seq_tile, Din), lambda b_, l: (b_, l, 0)),
            pl.BlockSpec((Din, D), lambda b_, l: (0, 0)),
            pl.BlockSpec((1, D), lambda b_, l: (0, 0)),
            # (L, D) PE with a wrapping index map -- no (B*L, D) tiled copy.
            pl.BlockSpec((seq_tile, D), lambda b_, l: (l, 0)),
        ],
        out_specs=pl.BlockSpec((1, seq_tile, D), lambda b_, l: (b_, l, 0)),
        compiler_params=_mosaic_params(("parallel", "parallel")),
    )(x, w_bf16, b.reshape(1, -1), pe)


def _attn_head_kernel(x_ref, dist_ref, wqkvs_ref, bqkvs_ref, wo_ref, bo_ref,
                      series_hbm_ref, prior_hbm_ref,
                      o_ref, series_ref, prior_ref,
                      xbf_sc, acc_sc, *, n_heads, d_k, d_v):
    # Grid = (batch, head).  Each step handles ONE head of ONE batch element.
    del series_hbm_ref, prior_hbm_ref   # aliased buffers; written via out refs
    hd = pl.program_id(1)

    @pl.when(hd == 0)
    def _init():
        x = x_ref[0]
        xbf_sc[...] = x.astype(jnp.bfloat16)       # cast once per batch element
        acc_sc[...] = x + bo_ref[...]              # residual + out-proj bias

    x_bf = xbf_sc[...]

    # Per-head fused [Q|K|V|sigma] projection: one MXU matmul, K = d_model.
    qkvs = (jnp.dot(x_bf, wqkvs_ref[0], preferred_element_type=jnp.float32)
            + bqkvs_ref[0])                                   # (L, 2dk+dv+1)
    q = qkvs[:, :d_k].astype(jnp.bfloat16)
    k = qkvs[:, d_k:2 * d_k].astype(jnp.bfloat16)
    v = qkvs[:, 2 * d_k:2 * d_k + d_v].astype(jnp.bfloat16)
    sig = qkvs[:, 2 * d_k + d_v:]                             # (L, 1) f32

    # series = softmax(Q K^T / sqrt(d_k)); transpose folded into dot_general
    # (contract dim 1 of both operands -- no XLU relayout of K).
    scores = jax.lax.dot_general(
        q, k, (((1,), (1,)), ((), ())),
        preferred_element_type=jnp.float32) * (1.0 / math.sqrt(d_k))
    m = jnp.max(scores, axis=-1, keepdims=True)
    e = jnp.exp(scores - m)
    series = e * pl.reciprocal(jnp.sum(e, axis=-1, keepdims=True), approx=True)

    # Gaussian prior from |i-j|^2 and the learned per-token sigma head; the
    # 1/(sqrt(2*pi)*sigma) prefactor cancels in the row normalization.
    # TODO(synk): on v6e/v7x run these big exps in bf16 (EUP becomes the
    # binding slot once series/prior writes are bf16); kept f32 for v5e.
    sigma = 1.0 / (1.0 + jnp.exp(-5.0 * sig)) + 1e-5          # sigmoid(5x)+eps
    sigma = jnp.exp(sigma * math.log(3.0)) - 1.0              # 3**sigma - 1
    g = jnp.exp(dist_ref[...] * (-0.5 / (sigma * sigma)))
    prior = g * pl.reciprocal(jnp.sum(g, axis=-1, keepdims=True), approx=True)

    # bf16 HBM writes (halved store traffic), straight into the stacked buffer.
    series_bf = series.astype(jnp.bfloat16)
    series_ref[0, 0] = series_bf
    prior_ref[0, 0] = prior.astype(jnp.bfloat16)

    # Head context folded into the shared output-projection accumulator
    # (single scratch accumulator -- no H live (L, D) f32 values).
    # TODO(synk): a single full-depth (L, H*d_v) @ (H*d_v, D) out-proj matmul
    # needs dynamic lane-offset stores; kept per-head K=d_v matmuls instead.
    ctx = jnp.dot(series_bf, v, preferred_element_type=jnp.float32)
    acc_sc[...] += jnp.dot(ctx.astype(jnp.bfloat16), wo_ref[0],
                           preferred_element_type=jnp.float32)

    @pl.when(hd == n_heads - 1)
    def _finalize():
        o_ref[0] = acc_sc[...]                    # x + attn_out (all heads)


def attention_layer(h, dist_sq, wqkvs, bqkvs, wo, bo, series_buf, prior_buf,
                    *, layer_idx, n_heads, d_k, d_v):
    B, L, D = h.shape
    Nh = wqkvs.shape[-1]                          # 2*d_k + d_v + 1
    lh_base = layer_idx * n_heads
    kernel = functools.partial(_attn_head_kernel,
                               n_heads=n_heads, d_k=d_k, d_v=d_v)
    return pl.pallas_call(
        kernel,
        out_shape=(
            jax.ShapeDtypeStruct((B, L, D), jnp.float32),
            jax.ShapeDtypeStruct(series_buf.shape, series_buf.dtype),
            jax.ShapeDtypeStruct(prior_buf.shape, prior_buf.dtype),
        ),
        grid=(B, n_heads),
        in_specs=[
            pl.BlockSpec((1, L, D), lambda b, hd: (b, 0, 0)),
            pl.BlockSpec((L, L), lambda b, hd: (0, 0)),
            pl.BlockSpec((1, D, Nh), lambda b, hd: (hd, 0, 0)),
            pl.BlockSpec((1, 1, Nh), lambda b, hd: (hd, 0, 0)),
            pl.BlockSpec((1, d_v, D), lambda b, hd: (hd, 0, 0)),
            pl.BlockSpec((1, D), lambda b, hd: (0, 0)),
            pl.BlockSpec(memory_space=pl.ANY),    # aliased series buffer
            pl.BlockSpec(memory_space=pl.ANY),    # aliased prior buffer
        ],
        out_specs=(
            pl.BlockSpec((1, L, D), lambda b, hd: (b, 0, 0)),
            pl.BlockSpec((1, 1, L, L), lambda b, hd: (b, lh_base + hd, 0, 0)),
            pl.BlockSpec((1, 1, L, L), lambda b, hd: (b, lh_base + hd, 0, 0)),
        ),
        scratch_shapes=[pltpu.VMEM((L, D), jnp.bfloat16),     # x in bf16
                        pltpu.VMEM((L, D), jnp.float32)],     # out-proj acc
        input_output_aliases={6: 1, 7: 2},
        compiler_params=_mosaic_params(("parallel", "arbitrary")),
    )(h, dist_sq, wqkvs, bqkvs, wo, bo.reshape(1, -1), series_buf, prior_buf)


def _ffn_ln_kernel(x_ref, w1_ref, b1_ref, w2_ref, b2_ref, g_ref, beta_ref,
                   o_ref):
    # EncoderLayer tail: LayerNorm(x + conv2(gelu(conv1(x))))  (k=1 convs
    # folded into channels-last matmuls).
    x = x_ref[...]
    h = (jnp.dot(x.astype(jnp.bfloat16), w1_ref[...],
                 preferred_element_type=jnp.float32) + b1_ref[...])
    h = jax.nn.gelu(h, approximate=True)  # TODO(synk): exact-erf GELU
    y = (jnp.dot(h.astype(jnp.bfloat16), w2_ref[...],
                 preferred_element_type=jnp.float32) + b2_ref[...])
    z = x + y
    mean = jnp.mean(z, axis=-1, keepdims=True)
    var = jnp.mean((z - mean) ** 2, axis=-1, keepdims=True)
    o_ref[...] = ((z - mean) * jax.lax.rsqrt(var + 1e-5)
                  * g_ref[...] + beta_ref[...])


def ffn_ln(x_flat, w1, b1, w2, b2, gamma, beta, *, row_tile):
    BL, D = x_flat.shape
    Dff = w1.shape[1]
    return pl.pallas_call(
        _ffn_ln_kernel,
        out_shape=jax.ShapeDtypeStruct((BL, D), jnp.float32),
        grid=(BL // row_tile,),
        in_specs=[
            pl.BlockSpec((row_tile, D), lambda i: (i, 0)),
            pl.BlockSpec((D, Dff), lambda i: (0, 0)),
            pl.BlockSpec((1, Dff), lambda i: (0, 0)),
            pl.BlockSpec((Dff, D), lambda i: (0, 0)),
            pl.BlockSpec((1, D), lambda i: (0, 0)),
            pl.BlockSpec((1, D), lambda i: (0, 0)),
            pl.BlockSpec((1, D), lambda i: (0, 0)),
        ],
        out_specs=pl.BlockSpec((row_tile, D), lambda i: (i, 0)),
        compiler_params=_mosaic_params(("parallel",)),
    )(x_flat, w1, b1.reshape(1, -1), w2, b2.reshape(1, -1),
      gamma.reshape(1, -1), beta.reshape(1, -1))


def _final_kernel(x_ref, g_ref, beta_ref, w_ref, b_ref, o_ref):
    # Final LayerNorm + output projection (d_model -> d_feature), fused.
    x = x_ref[...]
    mean = jnp.mean(x, axis=-1, keepdims=True)
    var = jnp.mean((x - mean) ** 2, axis=-1, keepdims=True)
    xn = (x - mean) * jax.lax.rsqrt(var + 1e-5) * g_ref[...] + beta_ref[...]
    o_ref[...] = (jnp.dot(xn.astype(jnp.bfloat16), w_ref[...],
                          preferred_element_type=jnp.float32) + b_ref[...])


def final_norm_proj(x_flat, gamma, beta, w, b, *, row_tile):
    BL, D = x_flat.shape
    Dout = w.shape[1]
    return pl.pallas_call(
        _final_kernel,
        out_shape=jax.ShapeDtypeStruct((BL, Dout), jnp.float32),
        grid=(BL // row_tile,),
        in_specs=[
            pl.BlockSpec((row_tile, D), lambda i: (i, 0)),
            pl.BlockSpec((1, D), lambda i: (0, 0)),
            pl.BlockSpec((1, D), lambda i: (0, 0)),
            pl.BlockSpec((D, Dout), lambda i: (0, 0)),
            pl.BlockSpec((1, Dout), lambda i: (0, 0)),
        ],
        out_specs=pl.BlockSpec((row_tile, Dout), lambda i: (i, 0)),
        compiler_params=_mosaic_params(("parallel",)),
    )(x_flat, gamma.reshape(1, -1), beta.reshape(1, -1), w, b.reshape(1, -1))


# ------------------------------ model glue ---------------------------------

def sinusoidal_pe(L, d_model):
    pos = jnp.arange(L, dtype=jnp.float32)[:, None]
    div = jnp.exp(jnp.arange(0, d_model, 2, dtype=jnp.float32)
                  * (-math.log(10000.0) / d_model))
    pe = jnp.zeros((L, d_model), jnp.float32)
    pe = pe.at[:, 0::2].set(jnp.sin(pos * div))
    pe = pe.at[:, 1::2].set(jnp.cos(pos * div))
    return pe


def distance_sq(L):
    idx = jnp.arange(L, dtype=jnp.float32)
    d = idx[:, None] - idx[None, :]
    return d * d


def _init_linear(key, din, dout):
    kw, kb = jax.random.split(key)
    scale = 1.0 / math.sqrt(din)
    w = jax.random.uniform(kw, (din, dout), jnp.float32, -scale, scale)
    b = jax.random.uniform(kb, (dout,), jnp.float32, -scale, scale)
    return w, b


def init_params(key, d_feature, d_model, d_ff, n_heads, d_k, d_v, n_layer):
    keys = jax.random.split(key, 2 + n_layer)
    p = {}
    emb_w, p["emb_b"] = _init_linear(keys[0], d_feature, d_model)
    p["emb_w"] = emb_w.astype(jnp.bfloat16)            # weights pre-cast bf16
    proj_w, p["proj_b"] = _init_linear(keys[1], d_model, d_feature)
    p["proj_w"] = proj_w.astype(jnp.bfloat16)
    p["norm_g"] = jnp.ones((d_model,), jnp.float32)
    p["norm_b"] = jnp.zeros((d_model,), jnp.float32)
    layers = []
    for li in range(n_layer):
        lk = jax.random.split(keys[2 + li], 7)
        lp = {}
        wq, bq = _init_linear(lk[0], d_model, n_heads * d_k)
        wk, bk = _init_linear(lk[1], d_model, n_heads * d_k)
        wv, bv = _init_linear(lk[2], d_model, n_heads * d_v)
        wsig, bsig = _init_linear(lk[3], d_model, n_heads)
        # Head-major fused [Q | K | V | sigma] weight: (H, D, 2*d_k+d_v+1) so
        # the head grid axis blocks it directly (one matmul per head step).
        # TODO(synk): at production d_k=64 pad each head slab to 128 lanes.
        wq_h = wq.reshape(d_model, n_heads, d_k).transpose(1, 0, 2)
        wk_h = wk.reshape(d_model, n_heads, d_k).transpose(1, 0, 2)
        wv_h = wv.reshape(d_model, n_heads, d_v).transpose(1, 0, 2)
        ws_h = wsig.reshape(d_model, n_heads, 1).transpose(1, 0, 2)
        lp["wqkvs"] = jnp.concatenate([wq_h, wk_h, wv_h, ws_h],
                                      axis=-1).astype(jnp.bfloat16)
        lp["bqkvs"] = jnp.concatenate(
            [bq.reshape(n_heads, 1, d_k), bk.reshape(n_heads, 1, d_k),
             bv.reshape(n_heads, 1, d_v), bsig.reshape(n_heads, 1, 1)],
            axis=-1)                                       # (H, 1, Nh) f32
        wo, lp["bo"] = _init_linear(lk[4], n_heads * d_v, d_model)
        lp["wo"] = wo.reshape(n_heads, d_v, d_model).astype(jnp.bfloat16)
        w1, lp["b1"] = _init_linear(lk[5], d_model, d_ff)
        lp["w1"] = w1.astype(jnp.bfloat16)
        w2, lp["b2"] = _init_linear(lk[6], d_ff, d_model)
        lp["w2"] = w2.astype(jnp.bfloat16)
        lp["ln_g"] = jnp.ones((d_model,), jnp.float32)
        lp["ln_b"] = jnp.zeros((d_model,), jnp.float32)
        layers.append(lp)
    p["layers"] = layers
    return p


def anomaly_transformer_forward(params, x, *, n_heads, d_k, d_v):
    B, L, d_feature = x.shape
    d_model = params["emb_w"].shape[1]
    n_layer = len(params["layers"])
    BL = B * L

    seq_tile = _row_tile(L)
    row_tile = _row_tile(BL)

    # DataEmbedding: value projection + PE (dropout = identity in eval).
    h = embed(x, params["emb_w"], params["emb_b"], sinusoidal_pe(L, d_model),
              seq_tile=seq_tile)

    dist_sq = distance_sq(L)      # |i-j|^2, hoisted and shared by all layers

    # series/prior written in place (bf16) by every layer's attention kernel
    # via input_output_aliases -- no jnp.stack HBM pass afterwards.
    series_buf = jnp.zeros((B, n_layer * n_heads, L, L), jnp.bfloat16)
    prior_buf = jnp.zeros((B, n_layer * n_heads, L, L), jnp.bfloat16)

    for li, lp in enumerate(params["layers"]):
        # AnomalyAttention: per-head QKV+sigma proj, softmax, Gaussian prior,
        # out-projection + residual, all inside one (B, H)-grid kernel.
        h, series_buf, prior_buf = attention_layer(
            h, dist_sq, lp["wqkvs"], lp["bqkvs"], lp["wo"], lp["bo"],
            series_buf, prior_buf, layer_idx=li,
            n_heads=n_heads, d_k=d_k, d_v=d_v)
        # FFN + residual + LayerNorm, row-tiled over B*L rows.
        h = ffn_ln(h.reshape(BL, d_model), lp["w1"], lp["b1"], lp["w2"],
                   lp["b2"], lp["ln_g"], lp["ln_b"],
                   row_tile=row_tile).reshape(B, L, d_model)

    out = final_norm_proj(h.reshape(BL, d_model), params["norm_g"],
                          params["norm_b"], params["proj_w"],
                          params["proj_b"],
                          row_tile=row_tile).reshape(B, L, d_feature)

    # torch.stack(list).transpose(0, 1) == (B, n_layer, H, L, L); this reshape
    # only splits a leading dim (no data movement).
    series = series_buf.reshape(B, n_layer, n_heads, L, L)
    prior = prior_buf.reshape(B, n_layer, n_heads, L, L)
    return out, series, prior


# --------------------------------- main -------------------------------------

if __name__ == "__main__":
    # Small, module-consistent configuration.
    B, L = 2, 16                      # batch, windows_size (sequence length)
    d_feature = 8
    d_model, d_ff = 32, 64
    n_heads, d_k, d_v = 4, 8, 8
    n_layer = 2

    key = jax.random.PRNGKey(0)
    k_param, k_x = jax.random.split(key)
    params = init_params(k_param, d_feature, d_model, d_ff,
                         n_heads, d_k, d_v, n_layer)
    x = jax.random.normal(k_x, (B, L, d_feature), jnp.float32)

    fwd = jax.jit(functools.partial(anomaly_transformer_forward,
                                    n_heads=n_heads, d_k=d_k, d_v=d_v))
    out, series, prior = fwd(params, x)
    jax.block_until_ready((out, series, prior))

    assert out.shape == (B, L, d_feature)
    assert series.shape == (B, n_layer, n_heads, L, L)
    assert prior.shape == (B, n_layer, n_heads, L, L)
    assert bool(jnp.all(jnp.isfinite(out)))
    assert bool(jnp.all(jnp.isfinite(series.astype(jnp.float32))))
    assert bool(jnp.all(jnp.isfinite(prior.astype(jnp.float32))))
    print("KERNEL_OK")
</pallas_src>

<mosaic_0001>
module attributes {stable_mosaic.version = 11 : i64} {
  func.func @_embed_kernel(%arg0: i32, %arg1: i32, %arg2: memref<1x16x8xf32, #tpu.memory_space<vmem>>, %arg3: memref<8x32xbf16, #tpu.memory_space<vmem>>, %arg4: memref<1x32xf32, #tpu.memory_space<vmem>>, %arg5: memref<16x32xf32, #tpu.memory_space<vmem>>, %arg6: memref<1x16x32xf32, #tpu.memory_space<vmem>>) attributes {dimension_semantics = [#tpu.dimension_semantics<parallel>, #tpu.dimension_semantics<parallel>], iteration_bounds = array<i64: 2, 1>, scalar_prefetch = 0 : i64, scratch_operands = 0 : i64, tpu.core_type = #tpu.core_type<tc>, window_params = [{transform_indices = @transform_0, window_bounds = array<i64: 1, 16, 8>}, {pipeline_mode = #tpu.pipeline_mode<synchronous>, transform_indices = @transform_1, window_bounds = array<i64: 8, 32>}, {pipeline_mode = #tpu.pipeline_mode<synchronous>, transform_indices = @transform_2, window_bounds = array<i64: 1, 32>}, {transform_indices = @transform_3, window_bounds = array<i64: 16, 32>}, {transform_indices = @transform_4, window_bounds = array<i64: 1, 16, 32>}]} {
    %c0 = arith.constant 0 : index
    %c0_0 = arith.constant 0 : index
    %c0_1 = arith.constant 0 : index
    %0 = vector.load %arg2[%c0, %c0_0, %c0_1] : memref<1x16x8xf32, #tpu.memory_space<vmem>>, vector<1x16x8xf32>
    %1 = vector.shape_cast %0 : vector<1x16x8xf32> to vector<16x8xf32>
    %2 = arith.truncf %1 : vector<16x8xf32> to vector<16x8xbf16>
    %c0_2 = arith.constant 0 : index
    %c0_3 = arith.constant 0 : index
    %3 = vector.load %arg3[%c0_2, %c0_3] : memref<8x32xbf16, #tpu.memory_space<vmem>>, vector<8x32xbf16>
    %cst = arith.constant dense<0.000000e+00> : vector<16x32xf32>
    %4 = tpu.matmul %2, %3, %cst {dimension_numbers = #tpu.dot_dimension_numbers<[1], [0], [0], [1], [0, 0, 1, 1], [], []>} : vector<16x8xbf16>, vector<8x32xbf16>, vector<16x32xf32> -> vector<16x32xf32>
    %c0_4 = arith.constant 0 : index
    %c0_5 = arith.constant 0 : index
    %5 = vector.load %arg4[%c0_4, %c0_5] : memref<1x32xf32, #tpu.memory_space<vmem>>, vector<1x32xf32>
    %6 = vector.broadcast %5 : vector<1x32xf32> to vector<16x32xf32>
    %7 = arith.addf %4, %6 : vector<16x32xf32>
    %c0_6 = arith.constant 0 : index
    %c0_7 = arith.constant 0 : index
    %8 = vector.load %arg5[%c0_6, %c0_7] : memref<16x32xf32, #tpu.memory_space<vmem>>, vector<16x32xf32>
    %9 = arith.addf %7, %8 : vector<16x32xf32>
    %c0_8 = arith.constant 0 : index
    %c0_9 = arith.constant 0 : index
    %c0_10 = arith.constant 0 : index
    %10 = vector.load %arg6[%c0_8, %c0_9, %c0_10] : memref<1x16x32xf32, #tpu.memory_space<vmem>>, vector<1x16x32xf32>
    %11 = vector.shape_cast %10 : vector<1x16x32xf32> to vector<16x32xf32>
    %12 = vector.shape_cast %9 : vector<16x32xf32> to vector<1x16x32xf32>
    tpu.vector_store %arg6[%c0_8, %c0_9, %c0_10], %12 {strides = array<i32>} : memref<1x16x32xf32, #tpu.memory_space<vmem>>, vector<1x16x32xf32>,
    return
  }
  func.func @transform_0(%arg0: i32, %arg1: i32) -> (i32, i32, i32) {
    %c0_i32 = arith.constant 0 : i32
    %c0_i32_0 = arith.constant 0 : i32
    return %arg0, %arg1, %c0_i32 : i32, i32, i32
  }
  func.func @transform_1(%arg0: i32, %arg1: i32) -> (i32, i32) {
    %c0_i32 = arith.constant 0 : i32
    %c0_i32_0 = arith.constant 0 : i32
    %c0_i32_1 = arith.constant 0 : i32
    return %c0_i32, %c0_i32_0 : i32, i32
  }
  func.func @transform_2(%arg0: i32, %arg1: i32) -> (i32, i32) {
    %c0_i32 = arith.constant 0 : i32
    %c0_i32_0 = arith.constant 0 : i32
    %c0_i32_1 = arith.constant 0 : i32
    return %c0_i32, %c0_i32_0 : i32, i32
  }
  func.func @transform_3(%arg0: i32, %arg1: i32) -> (i32, i32) {
    %c0_i32 = arith.constant 0 : i32
    %c0_i32_0 = arith.constant 0 : i32
    return %arg1, %c0_i32 : i32, i32
  }
  func.func @transform_4(%arg0: i32, %arg1: i32) -> (i32, i32, i32) {
    %c0_i32 = arith.constant 0 : i32
    %c0_i32_0 = arith.constant 0 : i32
    return %arg0, %arg1, %c0_i32 : i32, i32, i32
  }
}

module attributes {stable_mosaic.version = 11 : i64} {
  func.func @_attn_head_kernel(%arg0: i32, %arg1: i32, %arg2: memref<1x16x32xf32, #tpu.memory_space<vmem>>, %arg3: memref<16x16xf32, #tpu.memory_space<vmem>>, %arg4: memref<1x32x25xbf16, #tpu.memory_space<vmem>>, %arg5: memref<1x1x25xf32, #tpu.memory_space<vmem>>, %arg6: memref<1x8x32xbf16, #tpu.memory_space<vmem>>, %arg7: memref<1x32xf32, #tpu.memory_space<vmem>>, %arg8: memref<2x8x16x16xbf16, #tpu.memory_space<any>>, %arg9: memref<2x8x16x16xbf16, #tpu.memory_space<any>>, %arg10: memref<1x16x32xf32, #tpu.memory_space<vmem>>, %arg11: memref<1x1x16x16xbf16, #tpu.memory_space<vmem>>, %arg12: memref<1x1x16x16xbf16, #tpu.memory_space<vmem>>, %arg13: memref<16x32xbf16, #tpu.memory_space<vmem>>, %arg14: memref<16x32xf32, #tpu.memory_space<vmem>>) attributes {dimension_semantics = [#tpu.dimension_semantics<parallel>, #tpu.dimension_semantics<arbitrary>], iteration_bounds = array<i64: 2, 4>, scalar_prefetch = 0 : i64, scratch_operands = 2 : i64, tpu.core_type = #tpu.core_type<tc>, window_params = [{transform_indices = @transform_0, window_bounds = array<i64: 1, 16, 32>}, {pipeline_mode = #tpu.pipeline_mode<synchronous>, transform_indices = @transform_1, window_bounds = array<i64: 16, 16>}, {transform_indices = @transform_2, window_bounds = array<i64: 1, 32, 25>}, {transform_indices = @transform_3, window_bounds = array<i64: 1, 1, 25>}, {transform_indices = @transform_4, window_bounds = array<i64: 1, 8, 32>}, {pipeline_mode = #tpu.pipeline_mode<synchronous>, transform_indices = @transform_5, window_bounds = array<i64: 1, 32>}, {}, {}, {transform_indices = @transform_8, window_bounds = array<i64: 1, 16, 32>}, {transform_indices = @transform_9, window_bounds = array<i64: 1, 1, 16, 16>}, {transform_indices = @transform_10, window_bounds = array<i64: 1, 1, 16, 16>}]} {
    %c0_i32 = arith.constant 0 : i32
    %0 = arith.cmpi eq, %arg1, %c0_i32 : i32
    %1 = arith.extui %0 : i1 to i32
    %c0_i32_0 = arith.constant 0 : i32
    %2 = arith.cmpi ne, %1, %c0_i32_0 : i32
    scf.if %2 {
      %c0_40 = arith.constant 0 : index
      %c0_41 = arith.constant 0 : index
      %c0_42 = arith.constant 0 : index
      %76 = vector.load %arg2[%c0_40, %c0_41, %c0_42] : memref<1x16x32xf32, #tpu.memory_space<vmem>>, vector<1x16x32xf32>
      %77 = vector.shape_cast %76 : vector<1x16x32xf32> to vector<16x32xf32>
      %78 = arith.truncf %77 : vector<16x32xf32> to vector<16x32xbf16>
      %c0_43 = arith.constant 0 : index
      %c0_44 = arith.constant 0 : index
      %79 = vector.load %arg13[%c0_43, %c0_44] : memref<16x32xbf16, #tpu.memory_space<vmem>>, vector<16x32xbf16>
      tpu.vector_store %arg13[%c0_43, %c0_44], %78 {strides = array<i32>} : memref<16x32xbf16, #tpu.memory_space<vmem>>, vector<16x32xbf16>,
      %c0_45 = arith.constant 0 : index
      %c0_46 = arith.constant 0 : index
      %80 = vector.load %arg7[%c0_45, %c0_46] : memref<1x32xf32, #tpu.memory_space<vmem>>, vector<1x32xf32>
      %81 = vector.broadcast %80 : vector<1x32xf32> to vector<16x32xf32>
      %82 = arith.addf %77, %81 : vector<16x32xf32>
      %c0_47 = arith.constant 0 : index
      %c0_48 = arith.constant 0 : index
      %83 = vector.load %arg14[%c0_47, %c0_48] : memref<16x32xf32, #tpu.memory_space<vmem>>, vector<16x32xf32>
      tpu.vector_store %arg14[%c0_47, %c0_48], %82 {strides = array<i32>} : memref<16x32xf32, #tpu.memory_space<vmem>>, vector<16x32xf32>,
    } else {
    }
    %c0 = arith.constant 0 : index
    %c0_1 = arith.constant 0 : index
    %3 = vector.load %arg13[%c0, %c0_1] : memref<16x32xbf16, #tpu.memory_space<vmem>>, vector<16x32xbf16>
    %c0_2 = arith.constant 0 : index
    %c0_3 = arith.constant 0 : index
    %c0_4 = arith.constant 0 : index
    %4 = vector.load %arg4[%c0_2, %c0_3, %c0_4] : memref<1x32x25xbf16, #tpu.memory_space<vmem>>, vector<1x32x25xbf16>
    %5 = vector.shape_cast %4 : vector<1x32x25xbf16> to vector<32x25xbf16>
    %cst = arith.constant dense<0.000000e+00> : vector<16x25xf32>
    %6 = tpu.matmul %3, %5, %cst {dimension_numbers = #tpu.dot_dimension_numbers<[1], [0], [0], [1], [0, 0, 1, 1], [], []>} : vector<16x32xbf16>, vector<32x25xbf16>, vector<16x25xf32> -> vector<16x25xf32>
    %c0_5 = arith.constant 0 : index
    %c0_6 = arith.constant 0 : index
    %c0_7 = arith.constant 0 : index
    %7 = vector.load %arg5[%c0_5, %c0_6, %c0_7] : memref<1x1x25xf32, #tpu.memory_space<vmem>>, vector<1x1x25xf32>
    %8 = vector.shape_cast %7 : vector<1x1x25xf32> to vector<1x25xf32>
    %9 = vector.broadcast %8 : vector<1x25xf32> to vector<16x25xf32>
    %10 = arith.addf %6, %9 : vector<16x25xf32>
    %11 = vector.extract_strided_slice %10 {offsets = [0, 0], sizes = [16, 8], strides = [1, 1]} : vector<16x25xf32> to vector<16x8xf32>
    %12 = arith.truncf %11 : vector<16x8xf32> to vector<16x8xbf16>
    %13 = vector.extract_strided_slice %10 {offsets = [0, 8], sizes = [16, 8], strides = [1, 1]} : vector<16x25xf32> to vector<16x8xf32>
    %14 = arith.truncf %13 : vector<16x8xf32> to vector<16x8xbf16>
    %15 = vector.extract_strided_slice %10 {offsets = [0, 16], sizes = [16, 8], strides = [1, 1]} : vector<16x25xf32> to vector<16x8xf32>
    %16 = arith.truncf %15 : vector<16x8xf32> to vector<16x8xbf16>
    %17 = vector.extract_strided_slice %10 {offsets = [0, 24], sizes = [16, 1], strides = [1, 1]} : vector<16x25xf32> to vector<16x1xf32>
    %cst_8 = arith.constant dense<0.000000e+00> : vector<16x16xf32>
    %18 = tpu.matmul %12, %14, %cst_8 {dimension_numbers = #tpu.dot_dimension_numbers<[1], [1], [0], [0], [0, 0, 1, 0], [], []>} : vector<16x8xbf16>, vector<16x8xbf16>, vector<16x16xf32> -> vector<16x16xf32>
    %cst_9 = arith.constant 0.353553385 : f32
    %19 = vector.broadcast %cst_9 : f32 to vector<16x16xf32>
    %20 = arith.mulf %18, %19 : vector<16x16xf32>
    %cst_10 = arith.constant dense<0xFF800000> : vector<16xf32>
    %21 = vector.multi_reduction <maximumf>, %20, %cst_10 [1] : vector<16x16xf32> to vector<16xf32>
    %22 = vector.shape_cast %21 : vector<16xf32> to vector<16x1xf32>
    %23 = vector.broadcast %22 : vector<16x1xf32> to vector<16x16xf32>
    %24 = arith.subf %20, %23 : vector<16x16xf32>
    %25 = math.exp %24 : vector<16x16xf32>
    %cst_11 = arith.constant dense<0.000000e+00> : vector<16xf32>
    %26 = vector.multi_reduction <add>, %25, %cst_11 [1] : vector<16x16xf32> to vector<16xf32>
    %27 = vector.shape_cast %26 : vector<16xf32> to vector<16x1xf32>
    %28 = tpu.reciprocal %27 {approx = true} : vector<16x1xf32> -> vector<16x1xf32>
    %29 = vector.broadcast %28 : vector<16x1xf32> to vector<16x16xf32>
    %30 = arith.mulf %25, %29 : vector<16x16xf32>
    %cst_12 = arith.constant -5.000000e+00 : f32
    %31 = vector.broadcast %cst_12 : f32 to vector<16x1xf32>
    %32 = arith.mulf %31, %17 : vector<16x1xf32>
    %33 = math.exp %32 : vector<16x1xf32>
    %cst_13 = arith.constant 1.000000e+00 : f32
    %34 = vector.broadcast %cst_13 : f32 to vector<16x1xf32>
    %35 = arith.addf %34, %33 : vector<16x1xf32>
    %cst_14 = arith.constant 1.000000e+00 : f32
    %36 = vector.broadcast %cst_14 : f32 to vector<16x1xf32>
    %37 = arith.divf %36, %35 : vector<16x1xf32>
    %cst_15 = arith.constant 9.99999974E-6 : f32
    %38 = vector.broadcast %cst_15 : f32 to vector<16x1xf32>
    %39 = arith.addf %37, %38 : vector<16x1xf32>
    %cst_16 = arith.constant 1.09861231 : f32
    %40 = vector.broadcast %cst_16 : f32 to vector<16x1xf32>
    %41 = arith.mulf %39, %40 : vector<16x1xf32>
    %42 = math.exp %41 : vector<16x1xf32>
    %cst_17 = arith.constant 1.000000e+00 : f32
    %43 = vector.broadcast %cst_17 : f32 to vector<16x1xf32>
    %44 = arith.subf %42, %43 : vector<16x1xf32>
    %c0_18 = arith.constant 0 : index
    %c0_19 = arith.constant 0 : index
    %45 = vector.load %arg3[%c0_18, %c0_19] : memref<16x16xf32, #tpu.memory_space<vmem>>, vector<16x16xf32>
    %46 = arith.mulf %44, %44 : vector<16x1xf32>
    %cst_20 = arith.constant -5.000000e-01 : f32
    %47 = vector.broadcast %cst_20 : f32 to vector<16x1xf32>
    %48 = arith.divf %47, %46 : vector<16x1xf32>
    %49 = vector.broadcast %48 : vector<16x1xf32> to vector<16x16xf32>
    %50 = arith.mulf %45, %49 : vector<16x16xf32>
    %51 = math.exp %50 : vector<16x16xf32>
    %cst_21 = arith.constant dense<0.000000e+00> : vector<16xf32>
    %52 = vector.multi_reduction <add>, %51, %cst_21 [1] : vector<16x16xf32> to vector<16xf32>
    %53 = vector.shape_cast %52 : vector<16xf32> to vector<16x1xf32>
    %54 = tpu.reciprocal %53 {approx = true} : vector<16x1xf32> -> vector<16x1xf32>
    %55 = vector.broadcast %54 : vector<16x1xf32> to vector<16x16xf32>
    %56 = arith.mulf %51, %55 : vector<16x16xf32>
    %57 = arith.truncf %30 : vector<16x16xf32> to vector<16x16xbf16>
    %c0_22 = arith.constant 0 : index
    %c0_23 = arith.constant 0 : index
    %c0_24 = arith.constant 0 : index
    %c0_25 = arith.constant 0 : index
    %58 = vector.load %arg11[%c0_22, %c0_23, %c0_24, %c0_25] : memref<1x1x16x16xbf16, #tpu.memory_space<vmem>>, vector<1x1x16x16xbf16>
    %59 = vector.shape_cast %58 : vector<1x1x16x16xbf16> to vector<16x16xbf16>
    %60 = vector.shape_cast %57 : vector<16x16xbf16> to vector<1x1x16x16xbf16>
    tpu.vector_store %arg11[%c0_22, %c0_23, %c0_24, %c0_25], %60 {strides = array<i32>} : memref<1x1x16x16xbf16, #tpu.memory_space<vmem>>, vector<1x1x16x16xbf16>,
    %61 = arith.truncf %56 : vector<16x16xf32> to vector<16x16xbf16>
    %c0_26 = arith.constant 0 : index
    %c0_27 = arith.constant 0 : index
    %c0_28 = arith.constant 0 : index
    %c0_29 = arith.constant 0 : index
    %62 = vector.load %arg12[%c0_26, %c0_27, %c0_28, %c0_29] : memref<1x1x16x16xbf16, #tpu.memory_space<vmem>>, vector<1x1x16x16xbf16>
    %63 = vector.shape_cast %62 : vector<1x1x16x16xbf16> to vector<16x16xbf16>
    %64 = vector.shape_cast %61 : vector<16x16xbf16> to vector<1x1x16x16xbf16>
    tpu.vector_store %arg12[%c0_26, %c0_27, %c0_28, %c0_29], %64 {strides = array<i32>} : memref<1x1x16x16xbf16, #tpu.memory_space<vmem>>, vector<1x1x16x16xbf16>,
    %cst_30 = arith.constant dense<0.000000e+00> : vector<16x8xf32>
    %65 = tpu.matmul %57, %16, %cst_30 {dimension_numbers = #tpu.dot_dimension_numbers<[1], [0], [0], [1], [0, 0, 1, 1], [], []>} : vector<16x16xbf16>, vector<16x8xbf16>, vector<16x8xf32> -> vector<16x8xf32>
    %c0_31 = arith.constant 0 : index
    %c0_32 = arith.constant 0 : index
    %66 = vector.load %arg14[%c0_31, %c0_32] : memref<16x32xf32, #tpu.memory_space<vmem>>, vector<16x32xf32>
    %67 = arith.truncf %65 : vector<16x8xf32> to vector<16x8xbf16>
    %c0_33 = arith.constant 0 : index
    %c0_34 = arith.constant 0 : index
    %c0_35 = arith.constant 0 : index
    %68 = vector.load %arg6[%c0_33, %c0_34, %c0_35] : memref<1x8x32xbf16, #tpu.memory_space<vmem>>, vector<1x8x32xbf16>
    %69 = vector.shape_cast %68 : vector<1x8x32xbf16> to vector<8x32xbf16>
    %cst_36 = arith.constant dense<0.000000e+00> : vector<16x32xf32>
    %70 = tpu.matmul %67, %69, %cst_36 {dimension_numbers = #tpu.dot_dimension_numbers<[1], [0], [0], [1], [0, 0, 1, 1], [], []>} : vector<16x8xbf16>, vector<8x32xbf16>, vector<16x32xf32> -> vector<16x32xf32>
    %71 = arith.addf %66, %70 : vector<16x32xf32>
    %c0_37 = arith.constant 0 : index
    %c0_38 = arith.constant 0 : index
    %72 = vector.load %arg14[%c0_37, %c0_38] : memref<16x32xf32, #tpu.memory_space<vmem>>, vector<16x32xf32>
    tpu.vector_store %arg14[%c0_37, %c0_38], %71 {strides = array<i32>} : memref<16x32xf32, #tpu.memory_space<vmem>>, vector<16x32xf32>,
    %c3_i32 = arith.constant 3 : i32
    %73 = arith.cmpi eq, %arg1, %c3_i32 : i32
    %74 = arith.extui %73 : i1 to i32
    %c0_i32_39 = arith.constant 0 : i32
    %75 = arith.cmpi ne, %74, %c0_i32_39 : i32
    scf.if %75 {
      %c0_40 = arith.constant 0 : index
      %c0_41 = arith.constant 0 : index
      %76 = vector.load %arg14[%c0_40, %c0_41] : memref<16x32xf32, #tpu.memory_space<vmem>>, vector<16x32xf32>
      %c0_42 = arith.constant 0 : index
      %c0_43 = arith.constant 0 : index
      %c0_44 = arith.constant 0 : index
      %77 = vector.load %arg10[%c0_42, %c0_43, %c0_44] : memref<1x16x32xf32, #tpu.memory_space<vmem>>, vector<1x16x32xf32>
      %78 = vector.shape_cast %77 : vector<1x16x32xf32> to vector<16x32xf32>
      %79 = vector.shape_cast %76 : vector<16x32xf32> to vector<1x16x32xf32>
      tpu.vector_store %arg10[%c0_42, %c0_43, %c0_44], %79 {strides = array<i32>} : memref<1x16x32xf32, #tpu.memory_space<vmem>>, vector<1x16x32xf32>,
    } else {
    }
    return
  }
  func.func @transform_0(%arg0: i32, %arg1: i32) -> (i32, i32, i32) {
    %c0_i32 = arith.constant 0 : i32
    %c0_i32_0 = arith.constant 0 : i32
    %c0_i32_1 = arith.constant 0 : i32
    return %arg0, %c0_i32, %c0_i32_0 : i32, i32, i32
  }
  func.func @transform_1(%arg0: i32, %arg1: i32) -> (i32, i32) {
    %c0_i32 = arith.constant 0 : i32
    %c0_i32_0 = arith.constant 0 : i32
    %c0_i32_1 = arith.constant 0 : i32
    return %c0_i32, %c0_i32_0 : i32, i32
  }
  func.func @transform_2(%arg0: i32, %arg1: i32) -> (i32, i32, i32) {
    %c0_i32 = arith.constant 0 : i32
    %c0_i32_0 = arith.constant 0 : i32
    %c0_i32_1 = arith.constant 0 : i32
    return %arg1, %c0_i32, %c0_i32_0 : i32, i32, i32
  }
  func.func @transform_3(%arg0: i32, %arg1: i32) -> (i32, i32, i32) {
    %c0_i32 = arith.constant 0 : i32
    %c0_i32_0 = arith.constant 0 : i32
    %c0_i32_1 = arith.constant 0 : i32
    return %arg1, %c0_i32, %c0_i32_0 : i32, i32, i32
  }
  func.func @transform_4(%arg0: i32, %arg1: i32) -> (i32, i32, i32) {
    %c0_i32 = arith.constant 0 : i32
    %c0_i32_0 = arith.constant 0 : i32
    %c0_i32_1 = arith.constant 0 : i32
    return %arg1, %c0_i32, %c0_i32_0 : i32, i32, i32
  }
  func.func @transform_5(%arg0: i32, %arg1: i32) -> (i32, i32) {
    %c0_i32 = arith.constant 0 : i32
    %c0_i32_0 = arith.constant 0 : i32
    %c0_i32_1 = arith.constant 0 : i32
    return %c0_i32, %c0_i32_0 : i32, i32
  }
  func.func @transform_8(%arg0: i32, %arg1: i32) -> (i32, i32, i32) {
    %c0_i32 = arith.constant 0 : i32
    %c0_i32_0 = arith.constant 0 : i32
    %c0_i32_1 = arith.constant 0 : i32
    return %arg0, %c0_i32, %c0_i32_0 : i32, i32, i32
  }
  func.func @transform_9(%arg0: i32, %arg1: i32) -> (i32, i32, i32, i32) {
    %c0_i32 = arith.constant 0 : i32
    %0 = arith.addi %c0_i32, %arg1 : i32
    %c0_i32_0 = arith.constant 0 : i32
    %c0_i32_1 = arith.constant 0 : i32
    %c0_i32_2 = arith.constant 0 : i32
    return %arg0, %0, %c0_i32_0, %c0_i32_1 : i32, i32, i32, i32
  }
  func.func @transform_10(%arg0: i32, %arg1: i32) -> (i32, i32, i32, i32) {
    %c0_i32 = arith.constant 0 : i32
    %0 = arith.addi %c0_i32, %arg1 : i32
    %c0_i32_0 = arith.constant 0 : i32
    %c0_i32_1 = arith.constant 0 : i32
    %c0_i32_2 = arith.constant 0 : i32
    return %arg0, %0, %c0_i32_0, %c0_i32_1 : i32, i32, i32, i32
  }
}

module attributes {stable_mosaic.version = 11 : i64} {
  func.func @_ffn_ln_kernel(%arg0: i32, %arg1: memref<32x32xf32, #tpu.memory_space<vmem>>, %arg2: memref<32x64xbf16, #tpu.memory_space<vmem>>, %arg3: memref<1x64xf32, #tpu.memory_space<vmem>>, %arg4: memref<64x32xbf16, #tpu.memory_space<vmem>>, %arg5: memref<1x32xf32, #tpu.memory_space<vmem>>, %arg6: memref<1x32xf32, #tpu.memory_space<vmem>>, %arg7: memref<1x32xf32, #tpu.memory_space<vmem>>, %arg8: memref<32x32xf32, #tpu.memory_space<vmem>>) attributes {dimension_semantics = [#tpu.dimension_semantics<parallel>], iteration_bounds = array<i64: 1>, scalar_prefetch = 0 : i64, scratch_operands = 0 : i64, tpu.core_type = #tpu.core_type<tc>, window_params = [{transform_indices = @transform_0, window_bounds = array<i64: 32, 32>}, {pipeline_mode = #tpu.pipeline_mode<synchronous>, transform_indices = @transform_1, window_bounds = array<i64: 32, 64>}, {pipeline_mode = #tpu.pipeline_mode<synchronous>, transform_indices = @transform_2, window_bounds = array<i64: 1, 64>}, {pipeline_mode = #tpu.pipeline_mode<synchronous>, transform_indices = @transform_3, window_bounds = array<i64: 64, 32>}, {pipeline_mode = #tpu.pipeline_mode<synchronous>, transform_indices = @transform_4, window_bounds = array<i64: 1, 32>}, {pipeline_mode = #tpu.pipeline_mode<synchronous>, transform_indices = @transform_5, window_bounds = array<i64: 1, 32>}, {pipeline_mode = #tpu.pipeline_mode<synchronous>, transform_indices = @transform_6, window_bounds = array<i64: 1, 32>}, {transform_indices = @transform_7, window_bounds = array<i64: 32, 32>}]} {
    %c0 = arith.constant 0 : index
    %c0_0 = arith.constant 0 : index
    %0 = vector.load %arg1[%c0, %c0_0] : memref<32x32xf32, #tpu.memory_space<vmem>>, vector<32x32xf32>
    %1 = arith.truncf %0 : vector<32x32xf32> to vector<32x32xbf16>
    %c0_1 = arith.constant 0 : index
    %c0_2 = arith.constant 0 : index
    %2 = vector.load %arg2[%c0_1, %c0_2] : memref<32x64xbf16, #tpu.memory_space<vmem>>, vector<32x64xbf16>
    %cst = arith.constant dense<0.000000e+00> : vector<32x64xf32>
    %3 = tpu.matmul %1, %2, %cst {dimension_numbers = #tpu.dot_dimension_numbers<[1], [0], [0], [1], [0, 0, 1, 1], [], []>} : vector<32x32xbf16>, vector<32x64xbf16>, vector<32x64xf32> -> vector<32x64xf32>
    %c0_3 = arith.constant 0 : index
    %c0_4 = arith.constant 0 : index
    %4 = vector.load %arg3[%c0_3, %c0_4] : memref<1x64xf32, #tpu.memory_space<vmem>>, vector<1x64xf32>
    %5 = vector.broadcast %4 : vector<1x64xf32> to vector<32x64xf32>
    %6 = arith.addf %3, %5 : vector<32x64xf32>
    %7 = arith.mulf %6, %6 : vector<32x64xf32>
    %8 = arith.mulf %6, %7 : vector<32x64xf32>
    %cst_5 = arith.constant 4.471500e-02 : f32
    %9 = vector.broadcast %cst_5 : f32 to vector<32x64xf32>
    %10 = arith.mulf %9, %8 : vector<32x64xf32>
    %11 = arith.addf %6, %10 : vector<32x64xf32>
    %cst_6 = arith.constant 0.797884583 : f32
    %12 = vector.broadcast %cst_6 : f32 to vector<32x64xf32>
    %13 = arith.mulf %12, %11 : vector<32x64xf32>
    %14 = math.tanh %13 : vector<32x64xf32>
    %cst_7 = arith.constant 1.000000e+00 : f32
    %15 = vector.broadcast %cst_7 : f32 to vector<32x64xf32>
    %16 = arith.addf %15, %14 : vector<32x64xf32>
    %cst_8 = arith.constant 5.000000e-01 : f32
    %17 = vector.broadcast %cst_8 : f32 to vector<32x64xf32>
    %18 = arith.mulf %17, %16 : vector<32x64xf32>
    %19 = arith.mulf %6, %18 : vector<32x64xf32>
    %20 = arith.truncf %19 : vector<32x64xf32> to vector<32x64xbf16>
    %c0_9 = arith.constant 0 : index
    %c0_10 = arith.constant 0 : index
    %21 = vector.load %arg4[%c0_9, %c0_10] : memref<64x32xbf16, #tpu.memory_space<vmem>>, vector<64x32xbf16>
    %cst_11 = arith.constant dense<0.000000e+00> : vector<32x32xf32>
    %22 = tpu.matmul %20, %21, %cst_11 {dimension_numbers = #tpu.dot_dimension_numbers<[1], [0], [0], [1], [0, 0, 1, 1], [], []>} : vector<32x64xbf16>, vector<64x32xbf16>, vector<32x32xf32> -> vector<32x32xf32>
    %c0_12 = arith.constant 0 : index
    %c0_13 = arith.constant 0 : index
    %23 = vector.load %arg5[%c0_12, %c0_13] : memref<1x32xf32, #tpu.memory_space<vmem>>, vector<1x32xf32>
    %24 = vector.broadcast %23 : vector<1x32xf32> to vector<32x32xf32>
    %25 = arith.addf %22, %24 : vector<32x32xf32>
    %26 = arith.addf %0, %25 : vector<32x32xf32>
    %cst_14 = arith.constant dense<0.000000e+00> : vector<32xf32>
    %27 = vector.multi_reduction <add>, %26, %cst_14 [1] : vector<32x32xf32> to vector<32xf32>
    %28 = vector.shape_cast %27 : vector<32xf32> to vector<32x1xf32>
    %cst_15 = arith.constant 3.200000e+01 : f32
    %29 = vector.broadcast %cst_15 : f32 to vector<32x1xf32>
    %30 = arith.divf %28, %29 : vector<32x1xf32>
    %31 = vector.broadcast %30 : vector<32x1xf32> to vector<32x32xf32>
    %32 = arith.subf %26, %31 : vector<32x32xf32>
    %33 = arith.mulf %32, %32 : vector<32x32xf32>
    %cst_16 = arith.constant dense<0.000000e+00> : vector<32xf32>
    %34 = vector.multi_reduction <add>, %33, %cst_16 [1] : vector<32x32xf32> to vector<32xf32>
    %35 = vector.shape_cast %34 : vector<32xf32> to vector<32x1xf32>
    %cst_17 = arith.constant 3.200000e+01 : f32
    %36 = vector.broadcast %cst_17 : f32 to vector<32x1xf32>
    %37 = arith.divf %35, %36 : vector<32x1xf32>
    %38 = vector.broadcast %30 : vector<32x1xf32> to vector<32x32xf32>
    %39 = arith.subf %26, %38 : vector<32x32xf32>
    %cst_18 = arith.constant 9.99999974E-6 : f32
    %40 = vector.broadcast %cst_18 : f32 to vector<32x1xf32>
    %41 = arith.addf %37, %40 : vector<32x1xf32>
    %42 = math.rsqrt %41 : vector<32x1xf32>
    %43 = vector.broadcast %42 : vector<32x1xf32> to vector<32x32xf32>
    %44 = arith.mulf %39, %43 : vector<32x32xf32>
    %c0_19 = arith.constant 0 : index
    %c0_20 = arith.constant 0 : index
    %45 = vector.load %arg6[%c0_19, %c0_20] : memref<1x32xf32, #tpu.memory_space<vmem>>, vector<1x32xf32>
    %46 = vector.broadcast %45 : vector<1x32xf32> to vector<32x32xf32>
    %47 = arith.mulf %44, %46 : vector<32x32xf32>
    %c0_21 = arith.constant 0 : index
    %c0_22 = arith.constant 0 : index
    %48 = vector.load %arg7[%c0_21, %c0_22] : memref<1x32xf32, #tpu.memory_space<vmem>>, vector<1x32xf32>
    %49 = vector.broadcast %48 : vector<1x32xf32> to vector<32x32xf32>
    %50 = arith.addf %47, %49 : vector<32x32xf32>
    %c0_23 = arith.constant 0 : index
    %c0_24 = arith.constant 0 : index
    %51 = vector.load %arg8[%c0_23, %c0_24] : memref<32x32xf32, #tpu.memory_space<vmem>>, vector<32x32xf32>
    tpu.vector_store %arg8[%c0_23, %c0_24], %50 {strides = array<i32>} : memref<32x32xf32, #tpu.memory_space<vmem>>, vector<32x32xf32>,
    return
  }
  func.func @transform_0(%arg0: i32) -> (i32, i32) {
    %c0_i32 = arith.constant 0 : i32
    %c0_i32_0 = arith.constant 0 : i32
    return %arg0, %c0_i32 : i32, i32
  }
  func.func @transform_1(%arg0: i32) -> (i32, i32) {
    %c0_i32 = arith.constant 0 : i32
    %c0_i32_0 = arith.constant 0 : i32
    %c0_i32_1 = arith.constant 0 : i32
    return %c0_i32, %c0_i32_0 : i32, i32
  }
  func.func @transform_2(%arg0: i32) -> (i32, i32) {
    %c0_i32 = arith.constant 0 : i32
    %c0_i32_0 = arith.constant 0 : i32
    %c0_i32_1 = arith.constant 0 : i32
    return %c0_i32, %c0_i32_0 : i32, i32
  }
  func.func @transform_3(%arg0: i32) -> (i32, i32) {
    %c0_i32 = arith.constant 0 : i32
    %c0_i32_0 = arith.constant 0 : i32
    %c0_i32_1 = arith.constant 0 : i32
    return %c0_i32, %c0_i32_0 : i32, i32
  }
  func.func @transform_4(%arg0: i32) -> (i32, i32) {
    %c0_i32 = arith.constant 0 : i32
    %c0_i32_0 = arith.constant 0 : i32
    %c0_i32_1 = arith.constant 0 : i32
    return %c0_i32, %c0_i32_0 : i32, i32
  }
  func.func @transform_5(%arg0: i32) -> (i32, i32) {
    %c0_i32 = arith.constant 0 : i32
    %c0_i32_0 = arith.constant 0 : i32
    %c0_i32_1 = arith.constant 0 : i32
    return %c0_i32, %c0_i32_0 : i32, i32
  }
  func.func @transform_6(%arg0: i32) -> (i32, i32) {
    %c0_i32 = arith.constant 0 : i32
    %c0_i32_0 = arith.constant 0 : i32
    %c0_i32_1 = arith.constant 0 : i32
    return %c0_i32, %c0_i32_0 : i32, i32
  }
  func.func @transform_7(%arg0: i32) -> (i32, i32) {
    %c0_i32 = arith.constant 0 : i32
    %c0_i32_0 = arith.constant 0 : i32
    return %arg0, %c0_i32 : i32, i32
  }
}

module attributes {stable_mosaic.version = 11 : i64} {
  func.func @_attn_head_kernel(%arg0: i32, %arg1: i32, %arg2: memref<1x16x32xf32, #tpu.memory_space<vmem>>, %arg3: memref<16x16xf32, #tpu.memory_space<vmem>>, %arg4: memref<1x32x25xbf16, #tpu.memory_space<vmem>>, %arg5: memref<1x1x25xf32, #tpu.memory_space<vmem>>, %arg6: memref<1x8x32xbf16, #tpu.memory_space<vmem>>, %arg7: memref<1x32xf32, #tpu.memory_space<vmem>>, %arg8: memref<2x8x16x16xbf16, #tpu.memory_space<any>>, %arg9: memref<2x8x16x16xbf16, #tpu.memory_space<any>>, %arg10: memref<1x16x32xf32, #tpu.memory_space<vmem>>, %arg11: memref<1x1x16x16xbf16, #tpu.memory_space<vmem>>, %arg12: memref<1x1x16x16xbf16, #tpu.memory_space<vmem>>, %arg13: memref<16x32xbf16, #tpu.memory_space<vmem>>, %arg14: memref<16x32xf32, #tpu.memory_space<vmem>>) attributes {dimension_semantics = [#tpu.dimension_semantics<parallel>, #tpu.dimension_semantics<arbitrary>], iteration_bounds = array<i64: 2, 4>, scalar_prefetch = 0 : i64, scratch_operands = 2 : i64, tpu.core_type = #tpu.core_type<tc>, window_params = [{transform_indices = @transform_0, window_bounds = array<i64: 1, 16, 32>}, {pipeline_mode = #tpu.pipeline_mode<synchronous>, transform_indices = @transform_1, window_bounds = array<i64: 16, 16>}, {transform_indices = @transform_2, window_bounds = array<i64: 1, 32, 25>}, {transform_indices = @transform_3, window_bounds = array<i64: 1, 1, 25>}, {transform_indices = @transform_4, window_bounds = array<i64: 1, 8, 32>}, {pipeline_mode = #tpu.pipeline_mode<synchronous>, transform_indices = @transform_5, window_bounds = array<i64: 1, 32>}, {}, {}, {transform_indices = @transform_8, window_bounds = array<i64: 1, 16, 32>}, {transform_indices = @transform_9, window_bounds = array<i64: 1, 1, 16, 16>}, {transform_indices = @transform_10, window_bounds = array<i64: 1, 1, 16, 16>}]} {
    %c0_i32 = arith.constant 0 : i32
    %0 = arith.cmpi eq, %arg1, %c0_i32 : i32
    %1 = arith.extui %0 : i1 to i32
    %c0_i32_0 = arith.constant 0 : i32
    %2 = arith.cmpi ne, %1, %c0_i32_0 : i32
    scf.if %2 {
      %c0_40 = arith.constant 0 : index
      %c0_41 = arith.constant 0 : index
      %c0_42 = arith.constant 0 : index
      %76 = vector.load %arg2[%c0_40, %c0_41, %c0_42] : memref<1x16x32xf32, #tpu.memory_space<vmem>>, vector<1x16x32xf32>
      %77 = vector.shape_cast %76 : vector<1x16x32xf32> to vector<16x32xf32>
      %78 = arith.truncf %77 : vector<16x32xf32> to vector<16x32xbf16>
      %c0_43 = arith.constant 0 : index
      %c0_44 = arith.constant 0 : index
      %79 = vector.load %arg13[%c0_43, %c0_44] : memref<16x32xbf16, #tpu.memory_space<vmem>>, vector<16x32xbf16>
      tpu.vector_store %arg13[%c0_43, %c0_44], %78 {strides = array<i32>} : memref<16x32xbf16, #tpu.memory_space<vmem>>, vector<16x32xbf16>,
      %c0_45 = arith.constant 0 : index
      %c0_46 = arith.constant 0 : index
      %80 = vector.load %arg7[%c0_45, %c0_46] : memref<1x32xf32, #tpu.memory_space<vmem>>, vector<1x32xf32>
      %81 = vector.broadcast %80 : vector<1x32xf32> to vector<16x32xf32>
      %82 = arith.addf %77, %81 : vector<16x32xf32>
      %c0_47 = arith.constant 0 : index
      %c0_48 = arith.constant 0 : index
      %83 = vector.load %arg14[%c0_47, %c0_48] : memref<16x32xf32, #tpu.memory_space<vmem>>, vector<16x32xf32>
      tpu.vector_store %arg14[%c0_47, %c0_48], %82 {strides = array<i32>} : memref<16x32xf32, #tpu.memory_space<vmem>>, vector<16x32xf32>,
    } else {
    }
    %c0 = arith.constant 0 : index
    %c0_1 = arith.constant 0 : index
    %3 = vector.load %arg13[%c0, %c0_1] : memref<16x32xbf16, #tpu.memory_space<vmem>>, vector<16x32xbf16>
    %c0_2 = arith.constant 0 : index
    %c0_3 = arith.constant 0 : index
    %c0_4 = arith.constant 0 : index
    %4 = vector.load %arg4[%c0_2, %c0_3, %c0_4] : memref<1x32x25xbf16, #tpu.memory_space<vmem>>, vector<1x32x25xbf16>
    %5 = vector.shape_cast %4 : vector<1x32x25xbf16> to vector<32x25xbf16>
    %cst = arith.constant dense<0.000000e+00> : vector<16x25xf32>
    %6 = tpu.matmul %3, %5, %cst {dimension_numbers = #tpu.dot_dimension_numbers<[1], [0], [0], [1], [0, 0, 1, 1], [], []>} : vector<16x32xbf16>, vector<32x25xbf16>, vector<16x25xf32> -> vector<16x25xf32>
    %c0_5 = arith.constant 0 : index
    %c0_6 = arith.constant 0 : index
    %c0_7 = arith.constant 0 : index
    %7 = vector.load %arg5[%c0_5, %c0_6, %c0_7] : memref<1x1x25xf32, #tpu.memory_space<vmem>>, vector<1x1x25xf32>
    %8 = vector.shape_cast %7 : vector<1x1x25xf32> to vector<1x25xf32>
    %9 = vector.broadcast %8 : vector<1x25xf32> to vector<16x25xf32>
    %10 = arith.addf %6, %9 : vector<16x25xf32>
    %11 = vector.extract_strided_slice %10 {offsets = [0, 0], sizes = [16, 8], strides = [1, 1]} : vector<16x25xf32> to vector<16x8xf32>
    %12 = arith.truncf %11 : vector<16x8xf32> to vector<16x8xbf16>
    %13 = vector.extract_strided_slice %10 {offsets = [0, 8], sizes = [16, 8], strides = [1, 1]} : vector<16x25xf32> to vector<16x8xf32>
    %14 = arith.truncf %13 : vector<16x8xf32> to vector<16x8xbf16>
    %15 = vector.extract_strided_slice %10 {offsets = [0, 16], sizes = [16, 8], strides = [1, 1]} : vector<16x25xf32> to vector<16x8xf32>
    %16 = arith.truncf %15 : vector<16x8xf32> to vector<16x8xbf16>
    %17 = vector.extract_strided_slice %10 {offsets = [0, 24], sizes = [16, 1], strides = [1, 1]} : vector<16x25xf32> to vector<16x1xf32>
    %cst_8 = arith.constant dense<0.000000e+00> : vector<16x16xf32>
    %18 = tpu.matmul %12, %14, %cst_8 {dimension_numbers = #tpu.dot_dimension_numbers<[1], [1], [0], [0], [0, 0, 1, 0], [], []>} : vector<16x8xbf16>, vector<16x8xbf16>, vector<16x16xf32> -> vector<16x16xf32>
    %cst_9 = arith.constant 0.353553385 : f32
    %19 = vector.broadcast %cst_9 : f32 to vector<16x16xf32>
    %20 = arith.mulf %18, %19 : vector<16x16xf32>
    %cst_10 = arith.constant dense<0xFF800000> : vector<16xf32>
    %21 = vector.multi_reduction <maximumf>, %20, %cst_10 [1] : vector<16x16xf32> to vector<16xf32>
    %22 = vector.shape_cast %21 : vector<16xf32> to vector<16x1xf32>
    %23 = vector.broadcast %22 : vector<16x1xf32> to vector<16x16xf32>
    %24 = arith.subf %20, %23 : vector<16x16xf32>
    %25 = math.exp %24 : vector<16x16xf32>
    %cst_11 = arith.constant dense<0.000000e+00> : vector<16xf32>
    %26 = vector.multi_reduction <add>, %25, %cst_11 [1] : vector<16x16xf32> to vector<16xf32>
    %27 = vector.shape_cast %26 : vector<16xf32> to vector<16x1xf32>
    %28 = tpu.reciprocal %27 {approx = true} : vector<16x1xf32> -> vector<16x1xf32>
    %29 = vector.broadcast %28 : vector<16x1xf32> to vector<16x16xf32>
    %30 = arith.mulf %25, %29 : vector<16x16xf32>
    %cst_12 = arith.constant -5.000000e+00 : f32
    %31 = vector.broadcast %cst_12 : f32 to vector<16x1xf32>
    %32 = arith.mulf %31, %17 : vector<16x1xf32>
    %33 = math.exp %32 : vector<16x1xf32>
    %cst_13 = arith.constant 1.000000e+00 : f32
    %34 = vector.broadcast %cst_13 : f32 to vector<16x1xf32>
    %35 = arith.addf %34, %33 : vector<16x1xf32>
    %cst_14 = arith.constant 1.000000e+00 : f32
    %36 = vector.broadcast %cst_14 : f32 to vector<16x1xf32>
    %37 = arith.divf %36, %35 : vector<16x1xf32>
    %cst_15 = arith.constant 9.99999974E-6 : f32
    %38 = vector.broadcast %cst_15 : f32 to vector<16x1xf32>
    %39 = arith.addf %37, %38 : vector<16x1xf32>
    %cst_16 = arith.constant 1.09861231 : f32
    %40 = vector.broadcast %cst_16 : f32 to vector<16x1xf32>
    %41 = arith.mulf %39, %40 : vector<16x1xf32>
    %42 = math.exp %41 : vector<16x1xf32>
    %cst_17 = arith.constant 1.000000e+00 : f32
    %43 = vector.broadcast %cst_17 : f32 to vector<16x1xf32>
    %44 = arith.subf %42, %43 : vector<16x1xf32>
    %c0_18 = arith.constant 0 : index
    %c0_19 = arith.constant 0 : index
    %45 = vector.load %arg3[%c0_18, %c0_19] : memref<16x16xf32, #tpu.memory_space<vmem>>, vector<16x16xf32>
    %46 = arith.mulf %44, %44 : vector<16x1xf32>
    %cst_20 = arith.constant -5.000000e-01 : f32
    %47 = vector.broadcast %cst_20 : f32 to vector<16x1xf32>
    %48 = arith.divf %47, %46 : vector<16x1xf32>
    %49 = vector.broadcast %48 : vector<16x1xf32> to vector<16x16xf32>
    %50 = arith.mulf %45, %49 : vector<16x16xf32>
    %51 = math.exp %50 : vector<16x16xf32>
    %cst_21 = arith.constant dense<0.000000e+00> : vector<16xf32>
    %52 = vector.multi_reduction <add>, %51, %cst_21 [1] : vector<16x16xf32> to vector<16xf32>
    %53 = vector.shape_cast %52 : vector<16xf32> to vector<16x1xf32>
    %54 = tpu.reciprocal %53 {approx = true} : vector<16x1xf32> -> vector<16x1xf32>
    %55 = vector.broadcast %54 : vector<16x1xf32> to vector<16x16xf32>
    %56 = arith.mulf %51, %55 : vector<16x16xf32>
    %57 = arith.truncf %30 : vector<16x16xf32> to vector<16x16xbf16>
    %c0_22 = arith.constant 0 : index
    %c0_23 = arith.constant 0 : index
    %c0_24 = arith.constant 0 : index
    %c0_25 = arith.constant 0 : index
    %58 = vector.load %arg11[%c0_22, %c0_23, %c0_24, %c0_25] : memref<1x1x16x16xbf16, #tpu.memory_space<vmem>>, vector<1x1x16x16xbf16>
    %59 = vector.shape_cast %58 : vector<1x1x16x16xbf16> to vector<16x16xbf16>
    %60 = vector.shape_cast %57 : vector<16x16xbf16> to vector<1x1x16x16xbf16>
    tpu.vector_store %arg11[%c0_22, %c0_23, %c0_24, %c0_25], %60 {strides = array<i32>} : memref<1x1x16x16xbf16, #tpu.memory_space<vmem>>, vector<1x1x16x16xbf16>,
    %61 = arith.truncf %56 : vector<16x16xf32> to vector<16x16xbf16>
    %c0_26 = arith.constant 0 : index
    %c0_27 = arith.constant 0 : index
    %c0_28 = arith.constant 0 : index
    %c0_29 = arith.constant 0 : index
    %62 = vector.load %arg12[%c0_26, %c0_27, %c0_28, %c0_29] : memref<1x1x16x16xbf16, #tpu.memory_space<vmem>>, vector<1x1x16x16xbf16>
    %63 = vector.shape_cast %62 : vector<1x1x16x16xbf16> to vector<16x16xbf16>
    %64 = vector.shape_cast %61 : vector<16x16xbf16> to vector<1x1x16x16xbf16>
    tpu.vector_store %arg12[%c0_26, %c0_27, %c0_28, %c0_29], %64 {strides = array<i32>} : memref<1x1x16x16xbf16, #tpu.memory_space<vmem>>, vector<1x1x16x16xbf16>,
    %cst_30 = arith.constant dense<0.000000e+00> : vector<16x8xf32>
    %65 = tpu.matmul %57, %16, %cst_30 {dimension_numbers = #tpu.dot_dimension_numbers<[1], [0], [0], [1], [0, 0, 1, 1], [], []>} : vector<16x16xbf16>, vector<16x8xbf16>, vector<16x8xf32> -> vector<16x8xf32>
    %c0_31 = arith.constant 0 : index
    %c0_32 = arith.constant 0 : index
    %66 = vector.load %arg14[%c0_31, %c0_32] : memref<16x32xf32, #tpu.memory_space<vmem>>, vector<16x32xf32>
    %67 = arith.truncf %65 : vector<16x8xf32> to vector<16x8xbf16>
    %c0_33 = arith.constant 0 : index
    %c0_34 = arith.constant 0 : index
    %c0_35 = arith.constant 0 : index
    %68 = vector.load %arg6[%c0_33, %c0_34, %c0_35] : memref<1x8x32xbf16, #tpu.memory_space<vmem>>, vector<1x8x32xbf16>
    %69 = vector.shape_cast %68 : vector<1x8x32xbf16> to vector<8x32xbf16>
    %cst_36 = arith.constant dense<0.000000e+00> : vector<16x32xf32>
    %70 = tpu.matmul %67, %69, %cst_36 {dimension_numbers = #tpu.dot_dimension_numbers<[1], [0], [0], [1], [0, 0, 1, 1], [], []>} : vector<16x8xbf16>, vector<8x32xbf16>, vector<16x32xf32> -> vector<16x32xf32>
    %71 = arith.addf %66, %70 : vector<16x32xf32>
    %c0_37 = arith.constant 0 : index
    %c0_38 = arith.constant 0 : index
    %72 = vector.load %arg14[%c0_37, %c0_38] : memref<16x32xf32, #tpu.memory_space<vmem>>, vector<16x32xf32>
    tpu.vector_store %arg14[%c0_37, %c0_38], %71 {strides = array<i32>} : memref<16x32xf32, #tpu.memory_space<vmem>>, vector<16x32xf32>,
    %c3_i32 = arith.constant 3 : i32
    %73 = arith.cmpi eq, %arg1, %c3_i32 : i32
    %74 = arith.extui %73 : i1 to i32
    %c0_i32_39 = arith.constant 0 : i32
    %75 = arith.cmpi ne, %74, %c0_i32_39 : i32
    scf.if %75 {
      %c0_40 = arith.constant 0 : index
      %c0_41 = arith.constant 0 : index
      %76 = vector.load %arg14[%c0_40, %c0_41] : memref<16x32xf32, #tpu.memory_space<vmem>>, vector<16x32xf32>
      %c0_42 = arith.constant 0 : index
      %c0_43 = arith.constant 0 : index
      %c0_44 = arith.constant 0 : index
      %77 = vector.load %arg10[%c0_42, %c0_43, %c0_44] : memref<1x16x32xf32, #tpu.memory_space<vmem>>, vector<1x16x32xf32>
      %78 = vector.shape_cast %77 : vector<1x16x32xf32> to vector<16x32xf32>
      %79 = vector.shape_cast %76 : vector<16x32xf32> to vector<1x16x32xf32>
      tpu.vector_store %arg10[%c0_42, %c0_43, %c0_44], %79 {strides = array<i32>} : memref<1x16x32xf32, #tpu.memory_space<vmem>>, vector<1x16x32xf32>,
    } else {
    }
    return
  }
  func.func @transform_0(%arg0: i32, %arg1: i32) -> (i32, i32, i32) {
    %c0_i32 = arith.constant 0 : i32
    %c0_i32_0 = arith.constant 0 : i32
    %c0_i32_1 = arith.constant 0 : i32
    return %arg0, %c0_i32, %c0_i32_0 : i32, i32, i32
  }
  func.func @transform_1(%arg0: i32, %arg1: i32) -> (i32, i32) {
    %c0_i32 = arith.constant 0 : i32
    %c0_i32_0 = arith.constant 0 : i32
    %c0_i32_1 = arith.constant 0 : i32
    return %c0_i32, %c0_i32_0 : i32, i32
  }
  func.func @transform_2(%arg0: i32, %arg1: i32) -> (i32, i32, i32) {
    %c0_i32 = arith.constant 0 : i32
    %c0_i32_0 = arith.constant 0 : i32
    %c0_i32_1 = arith.constant 0 : i32
    return %arg1, %c0_i32, %c0_i32_0 : i32, i32, i32
  }
  func.func @transform_3(%arg0: i32, %arg1: i32) -> (i32, i32, i32) {
    %c0_i32 = arith.constant 0 : i32
    %c0_i32_0 = arith.constant 0 : i32
    %c0_i32_1 = arith.constant 0 : i32
    return %arg1, %c0_i32, %c0_i32_0 : i32, i32, i32
  }
  func.func @transform_4(%arg0: i32, %arg1: i32) -> (i32, i32, i32) {
    %c0_i32 = arith.constant 0 : i32
    %c0_i32_0 = arith.constant 0 : i32
    %c0_i32_1 = arith.constant 0 : i32
    return %arg1, %c0_i32, %c0_i32_0 : i32, i32, i32
  }
  func.func @transform_5(%arg0: i32, %arg1: i32) -> (i32, i32) {
    %c0_i32 = arith.constant 0 : i32
    %c0_i32_0 = arith.constant 0 : i32
    %c0_i32_1 = arith.constant 0 : i32
    return %c0_i32, %c0_i32_0 : i32, i32
  }
  func.func @transform_8(%arg0: i32, %arg1: i32) -> (i32, i32, i32) {
    %c0_i32 = arith.constant 0 : i32
    %c0_i32_0 = arith.constant 0 : i32
    %c0_i32_1 = arith.constant 0 : i32
    return %arg0, %c0_i32, %c0_i32_0 : i32, i32, i32
  }
  func.func @transform_9(%arg0: i32, %arg1: i32) -> (i32, i32, i32, i32) {
    %c4_i32 = arith.constant 4 : i32
    %0 = arith.addi %c4_i32, %arg1 : i32
    %c0_i32 = arith.constant 0 : i32
    %c0_i32_0 = arith.constant 0 : i32
    %c0_i32_1 = arith.constant 0 : i32
    return %arg0, %0, %c0_i32, %c0_i32_0 : i32, i32, i32, i32
  }
  func.func @transform_10(%arg0: i32, %arg1: i32) -> (i32, i32, i32, i32) {
    %c4_i32 = arith.constant 4 : i32
    %0 = arith.addi %c4_i32, %arg1 : i32
    %c0_i32 = arith.constant 0 : i32
    %c0_i32_0 = arith.constant 0 : i32
    %c0_i32_1 = arith.constant 0 : i32
    return %arg0, %0, %c0_i32, %c0_i32_0 : i32, i32, i32, i32
  }
}

module attributes {stable_mosaic.version = 11 : i64} {
  func.func @_final_kernel(%arg0: i32, %arg1: memref<32x32xf32, #tpu.memory_space<vmem>>, %arg2: memref<1x32xf32, #tpu.memory_space<vmem>>, %arg3: memref<1x32xf32, #tpu.memory_space<vmem>>, %arg4: memref<32x8xbf16, #tpu.memory_space<vmem>>, %arg5: memref<1x8xf32, #tpu.memory_space<vmem>>, %arg6: memref<32x8xf32, #tpu.memory_space<vmem>>) attributes {dimension_semantics = [#tpu.dimension_semantics<parallel>], iteration_bounds = array<i64: 1>, scalar_prefetch = 0 : i64, scratch_operands = 0 : i64, tpu.core_type = #tpu.core_type<tc>, window_params = [{transform_indices = @transform_0, window_bounds = array<i64: 32, 32>}, {pipeline_mode = #tpu.pipeline_mode<synchronous>, transform_indices = @transform_1, window_bounds = array<i64: 1, 32>}, {pipeline_mode = #tpu.pipeline_mode<synchronous>, transform_indices = @transform_2, window_bounds = array<i64: 1, 32>}, {pipeline_mode = #tpu.pipeline_mode<synchronous>, transform_indices = @transform_3, window_bounds = array<i64: 32, 8>}, {pipeline_mode = #tpu.pipeline_mode<synchronous>, transform_indices = @transform_4, window_bounds = array<i64: 1, 8>}, {transform_indices = @transform_5, window_bounds = array<i64: 32, 8>}]} {
    %c0 = arith.constant 0 : index
    %c0_0 = arith.constant 0 : index
    %0 = vector.load %arg1[%c0, %c0_0] : memref<32x32xf32, #tpu.memory_space<vmem>>, vector<32x32xf32>
    %cst = arith.constant dense<0.000000e+00> : vector<32xf32>
    %1 = vector.multi_reduction <add>, %0, %cst [1] : vector<32x32xf32> to vector<32xf32>
    %2 = vector.shape_cast %1 : vector<32xf32> to vector<32x1xf32>
    %cst_1 = arith.constant 3.200000e+01 : f32
    %3 = vector.broadcast %cst_1 : f32 to vector<32x1xf32>
    %4 = arith.divf %2, %3 : vector<32x1xf32>
    %5 = vector.broadcast %4 : vector<32x1xf32> to vector<32x32xf32>
    %6 = arith.subf %0, %5 : vector<32x32xf32>
    %7 = arith.mulf %6, %6 : vector<32x32xf32>
    %cst_2 = arith.constant dense<0.000000e+00> : vector<32xf32>
    %8 = vector.multi_reduction <add>, %7, %cst_2 [1] : vector<32x32xf32> to vector<32xf32>
    %9 = vector.shape_cast %8 : vector<32xf32> to vector<32x1xf32>
    %cst_3 = arith.constant 3.200000e+01 : f32
    %10 = vector.broadcast %cst_3 : f32 to vector<32x1xf32>
    %11 = arith.divf %9, %10 : vector<32x1xf32>
    %12 = vector.broadcast %4 : vector<32x1xf32> to vector<32x32xf32>
    %13 = arith.subf %0, %12 : vector<32x32xf32>
    %cst_4 = arith.constant 9.99999974E-6 : f32
    %14 = vector.broadcast %cst_4 : f32 to vector<32x1xf32>
    %15 = arith.addf %11, %14 : vector<32x1xf32>
    %16 = math.rsqrt %15 : vector<32x1xf32>
    %17 = vector.broadcast %16 : vector<32x1xf32> to vector<32x32xf32>
    %18 = arith.mulf %13, %17 : vector<32x32xf32>
    %c0_5 = arith.constant 0 : index
    %c0_6 = arith.constant 0 : index
    %19 = vector.load %arg2[%c0_5, %c0_6] : memref<1x32xf32, #tpu.memory_space<vmem>>, vector<1x32xf32>
    %20 = vector.broadcast %19 : vector<1x32xf32> to vector<32x32xf32>
    %21 = arith.mulf %18, %20 : vector<32x32xf32>
    %c0_7 = arith.constant 0 : index
    %c0_8 = arith.constant 0 : index
    %22 = vector.load %arg3[%c0_7, %c0_8] : memref<1x32xf32, #tpu.memory_space<vmem>>, vector<1x32xf32>
    %23 = vector.broadcast %22 : vector<1x32xf32> to vector<32x32xf32>
    %24 = arith.addf %21, %23 : vector<32x32xf32>
    %25 = arith.truncf %24 : vector<32x32xf32> to vector<32x32xbf16>
    %c0_9 = arith.constant 0 : index
    %c0_10 = arith.constant 0 : index
    %26 = vector.load %arg4[%c0_9, %c0_10] : memref<32x8xbf16, #tpu.memory_space<vmem>>, vector<32x8xbf16>
    %cst_11 = arith.constant dense<0.000000e+00> : vector<32x8xf32>
    %27 = tpu.matmul %25, %26, %cst_11 {dimension_numbers = #tpu.dot_dimension_numbers<[1], [0], [0], [1], [0, 0, 1, 1], [], []>} : vector<32x32xbf16>, vector<32x8xbf16>, vector<32x8xf32> -> vector<32x8xf32>
    %c0_12 = arith.constant 0 : index
    %c0_13 = arith.constant 0 : index
    %28 = vector.load %arg5[%c0_12, %c0_13] : memref<1x8xf32, #tpu.memory_space<vmem>>, vector<1x8xf32>
    %29 = vector.broadcast %28 : vector<1x8xf32> to vector<32x8xf32>
    %30 = arith.addf %27, %29 : vector<32x8xf32>
    %c0_14 = arith.constant 0 : index
    %c0_15 = arith.constant 0 : index
    %31 = vector.load %arg6[%c0_14, %c0_15] : memref<32x8xf32, #tpu.memory_space<vmem>>, vector<32x8xf32>
    tpu.vector_store %arg6[%c0_14, %c0_15], %30 {strides = array<i32>} : memref<32x8xf32, #tpu.memory_space<vmem>>, vector<32x8xf32>,
    return
  }
  func.func @transform_0(%arg0: i32) -> (i32, i32) {
    %c0_i32 = arith.constant 0 : i32
    %c0_i32_0 = arith.constant 0 : i32
    return %arg0, %c0_i32 : i32, i32
  }
  func.func @transform_1(%arg0: i32) -> (i32, i32) {
    %c0_i32 = arith.constant 0 : i32
    %c0_i32_0 = arith.constant 0 : i32
    %c0_i32_1 = arith.constant 0 : i32
    return %c0_i32, %c0_i32_0 : i32, i32
  }
  func.func @transform_2(%arg0: i32) -> (i32, i32) {
    %c0_i32 = arith.constant 0 : i32
    %c0_i32_0 = arith.constant 0 : i32
    %c0_i32_1 = arith.constant 0 : i32
    return %c0_i32, %c0_i32_0 : i32, i32
  }
  func.func @transform_3(%arg0: i32) -> (i32, i32) {
    %c0_i32 = arith.constant 0 : i32
    %c0_i32_0 = arith.constant 0 : i32
    %c0_i32_1 = arith.constant 0 : i32
    return %c0_i32, %c0_i32_0 : i32, i32
  }
  func.func @transform_4(%arg0: i32) -> (i32, i32) {
    %c0_i32 = arith.constant 0 : i32
    %c0_i32_0 = arith.constant 0 : i32
    %c0_i32_1 = arith.constant 0 : i32
    return %c0_i32, %c0_i32_0 : i32, i32
  }
  func.func @transform_5(%arg0: i32) -> (i32, i32) {
    %c0_i32 = arith.constant 0 : i32
    %c0_i32_0 = arith.constant 0 : i32
    return %arg0, %c0_i32 : i32, i32
  }
}

</mosaic_0001>

<bundles_post_ra>
// kernel: anomaly_transformer_forward.6
= control target key start
LH: loop header
LB: loop body
LE: loop exit
PB: predicated region body
PF: predicated region fallthrough
CT: control target
= control target key end

     0   :  { %s488_s15 = smov 0   ;;  %s490_s16 = smov 0   ;;  %s533_s0 = inlined_call_operand.vmem [shape: f32[2,16,8], index: 0, kind: input, shape index: {}]   ;;  %s534_s1 = inlined_call_operand.vmem [shape: bf16[8,32], index: 1, kind: input, shape index: {}]   ;;  %s535_s2 = inlined_call_operand.vmem [shape: f32[1,32], index: 2, kind: input, shape index: {}]   ;;  %s536_s3 = inlined_call_operand.vmem [shape: f32[16,32], index: 3, kind: input, shape index: {}]   ;;  %s537_s4 = inlined_call_operand.vmem [shape: f32[2,16,32], index: 4, kind: output, shape index: {}]  }
   0x1   :  { %s492_s17 = smov 0  }
   0x2 LB: > { %s26_s18 = sadd.s32 1, %s457_s16  ;;  %p404_p0 = scmp.ge.s32.totalorder %s461_s17, 1  ;;  %s461_s17 = sphi %s492_s17, %s14_s17   ;;  %s457_s16 = sphi %s490_s16, %s539_s16   ;;  %s453_s15 = sphi %s488_s15, %s538_s15  }
   0x3   : > { %p28_p1 = scmp.ge.s32.totalorder %s26_s18, 2  ;;  %p194_p2 = scmp.lt.s32.totalorder %s461_s17, 3 }
   0x5   : > { %s541_s18 = smov (%p28_p1, %s26_s18), 0  ;;  %p195_p3 = pnand %p404_p0, %p194_p2 }
   0x6   : > { %p234_p4 = scmp.lt.s32.totalorder (!%p195_p3), %s453_s15, 1 }
   0x7   : > { %198 = sbr.rel (%p195_p3) target bundleno = 157 (0x9d), region = 36 }
   0xc   : > { %v263_v0 = vld [vmem:[%s534_s1] sm:$0xf]  ;;  %vm272_vm0 = vcmask 1043456   ;;  %s543_s15 = smov (!%p234_p4, %s453_s15), 1  ;;  %vm268_vm1 = vcmask 64512   ;;  %vm294_vm2 = vcmask 261120  }
   0xd   : > { %v274_v1 = vsel %vm272_vm0, %v263_v0, 0  ;;  %s412_s21 = sshll.u32 %s543_s15, 4  ;;  %v438_v5 = vld [vmem:[%s535_s2] ss:$0 sm:$0xff]  ;;  %v291_v11 = vld [vmem:[%s536_s3 + $0x8] sm:$0xff] }
   0xe   : > { %283 = vmatpush.bf16.msra.mxu0 %v274_v1  ;;  %s241_s24 = scalar_lea.vmem %s533_s0, %s412_s21  ;;  %v290_v7 = vld [vmem:[%s536_s3] sm:$0xff]  ;;  %s257_s5 = scalar_lea.vmem %s537_s4, %s412_s21 }
   0xf   : > { %v260_v2 = vld [vmem:[%s241_s24] sm:$0xff]  ;;  %v261_v3 = vld [vmem:[%s241_s24 + $0x8] sm:$0xff] }
  0x10   : > { %v262_v4 = vpack.c.bf16 %v261_v3, %v260_v2 }
  0x12   : > { %409 = vmatmul.msk.bf16.vlgmr.msra.gmra.mxu0 %vm268_vm1, %v262_v4 }
  0x8f   : > { %v285_v6 = vpop.f32.mrf.mxu0 }
  0x90   : > { %v286_v8 = vadd.f32 %v438_v5, %v285_v6 }
  0x92   : > { %v292_v9 = vadd.f32 %v290_v7, %v286_v8 }
  0x94   : > { %295 = vst.msk [vmem:[%s257_s5] sm:$0xff] %vm294_vm2, %v292_v9 }
  0x97   : > { %v287_v10 = vpop.f32.mrf.mxu0 }
  0x98   : > { %v288_v12 = vadd.f32 %v438_v5, %v287_v10 }
  0x9a   : > { %v293_v13 = vadd.f32 %v291_v11, %v288_v12 }
  0x9c   : > { %296 = vst.msk [vmem:[%s257_s5 + $0x8] sm:$0xff] %vm294_vm2, %v293_v13 }
  0x9d PF: > { %s14_s17 = sadd.s32 1, %s461_s17   ;;  %s538_s15 = smov %s457_s16 }
  0x9e   : > { %p11_p5 = scmp.ge.s32.totalorder %s14_s17, 4   ;;  %s539_s16 = smov %s541_s18 }
  0xa0   :  { %13 = sbr.rel (!%p11_p5) target bundleno = 2 (0x2), region = 69 }

// kernel: anomaly_transformer_forward.7
= control target key start
LH: loop header
LB: loop body
LE: loop exit
PB: predicated region body
PF: predicated region fallthrough
CT: control target
= control target key end

     0   :  { %s1140_s13 = smov 0   ;;  %s1142_s14 = smov 0   ;;  %s1280_s0 = inlined_call_operand.vmem [shape: f32[2,16,32], index: 0, kind: input, shape index: {}]   ;;  %s1281_s1 = inlined_call_operand.vmem [shape: f32[16,16], index: 1, kind: input, shape index: {}]   ;;  %s1282_s2 = inlined_call_operand.vmem [shape: bf16[4,32,25], index: 2, kind: input, shape index: {}]   ;;  %s1283_s3 = inlined_call_operand.vmem [shape: f32[4,1,25], index: 3, kind: input, shape index: {}]   ;;  %s1284_s4 = inlined_call_operand.vmem [shape: bf16[4,8,32], index: 4, kind: input, shape index: {}]   ;;  %s1285_s5 = inlined_call_operand.vmem [shape: f32[1,32], index: 5, kind: input, shape index: {}]   ;;  %s1286_s6 = inlined_call_operand.vmem [shape: bf16[2,8,16,16], index: 6, kind: input, shape index: {}, may-alias: {6,9}]   ;;  %s1287_s7 = inlined_call_operand.vmem [shape: bf16[2,8,16,16], index: 7, kind: input, shape index: {}, may-alias: {7,10}]   ;;  %s1288_s8 = inlined_call_operand.vmem [shape: f32[2,16,32], index: 8, kind: output, shape index: {0}]   ;;  %s1289_s9 = inlined_call_operand.vmem [shape: bf16[2,8,16,16], index: 9, kind: output, shape index: {1}, may-alias: {6,9}]   ;;  %s1290_s10 = inlined_call_operand.vmem [shape: bf16[2,8,16,16], index: 10, kind: output, shape index: {2}, may-alias: {7,10}]  }
   0x1   :  { %1292 = sst [smem:[#allocation7_spill]] %s1280_s0  ;;  %s1144_s15 = smov 0  }
   0x2   :  { %s1146_s16 = smov 0   ;;  %s1148_s6 = smov 0  }
   0x3 LB: > { %1293 = sst [smem:[#allocation4_spill]] %s1076_s16  ;;  %s30_s7 = sadd.s32 1, %s1072_s15  ;;  %s1080_s6 = sphi %s1148_s6, %s21_s6   ;;  %s1076_s16 = sphi %s1146_s16, %s1300_s16   ;;  %s1072_s15 = sphi %s1144_s15, %s1302_s15   ;;  %s1068_s14 = sphi %s1142_s14, %s1298_s14   ;;  %s1064_s13 = sphi %s1140_s13, %s1301_s13  }
   0x4   : > { %s33_s17 = sadd.s32 1, %s1076_s16  ;;  %p31_p0 = scmp.ge.s32.totalorder %s30_s7, 4 }
   0x5   : > { %p920_p1 = scmp.ge.s32.totalorder %s1080_s6, 1  ;;  %p312_p2 = scmp.lt.s32.totalorder %s1080_s6, 9 }
   0x6   : > { %s1304_s7 = smov (%p31_p0, %s30_s7), 0  ;;  %s1306_s17 = smov (!%p31_p0, %s33_s17), %s1076_s16 }
   0x7   : > { %1294 = sst [smem:[#allocation5_spill]] %s1304_s7  ;;  %p313_p3 = pnand %p920_p1, %p312_p2 }
   0x8   : > { %p35_p4 = scmp.ge.s32.totalorder %s1306_s17, 2  ;;  %p376_p5 = scmp.lt.s32.totalorder (!%p313_p3), %s1068_s14, 1 }
   0x9   : > { %316 = sbr.rel (%p313_p3) target bundleno = 991 (0x3df), region = 44  ;;  %p381_p6 = scmp.lt.s32.totalorder (!%p313_p3), %s1064_s13, 3 }
   0xa   : > { %s1308_s17 = smov (%p35_p4, %s1306_s17), 0  ;;  %p400_p7 = scmp.lt.s32.totalorder (!%p313_p3), %s1064_s13, 7 }
   0xb   : > { %1295 = sst [smem:[#allocation6_spill]] %s1308_s17  ;;  %p934_p8 = scmp.ne.s32.totalorder (!%p313_p3), %s1064_s13, 0 }
   0xc   : > { %s1296_s0 = sld [smem:[#allocation7_spill]] (!%p313_p3) }
   0xe   : > { %s1310_s14 = smov (!%p376_p5, %s1068_s14), 1 }
   0xf   : > { %s1174_s18 = scalar_select %p381_p6, %s1064_s13, 3 }
  0x10   : > { %s956_s19 = sshll.u32 %s1310_s14, 4 }
  0x11   : > { %s957_s23 = sshll.u32 %s1174_s18, 4  ;;  %s925_s30 = sshll.u32 %s1174_s18, 2 }
  0x12   : > { %s380_s22 = scalar_lea.vmem %s1296_s0, %s956_s19  ;;  %s385_s26 = scalar_lea.vmem %s1282_s2, %s957_s23 }
  0x13   : > { %s1192_s17 = scalar_lea.vmem %s1288_s8, %s956_s19  ;;  %s1197_s20 = scalar_lea.vmem %s1284_s4, %s925_s30 }
  0x14   : > { %s401_s21 = scalar_select %p400_p7, %s1064_s13, 7 }
  0x15   : > { %420 = sbr.rel (%p934_p8) target bundleno = 33 (0x21), region = 48 }
  0x16   : > { %s928_s0 = sshll.u32 %s401_s21, 1 }
  0x17   : > { %s404_s16 = sadd.s32 %s956_s19, %s928_s0 }
  0x18   : > { %s930_s24 = sshll.u32 %s404_s16, 2 }
  0x19   : > { %s1203_s27 = scalar_lea.vmem %s1289_s9, %s930_s24  ;;  %s1208_s11 = scalar_lea.vmem %s1290_s10, %s930_s24 }
  0x1a   : > { %v421_v0 = vld [vmem:[%s380_s22] sm:$0xff]  ;;  %vm425_vm0 = vcmask 257024   ;;  %v422_v1 = vld [vmem:[%s380_s22 + $0x8] sm:$0xff]  ;;  %vm434_vm1 = vcmask 261120  }
  0x1b   : > { %v423_v2 = vpack.c.bf16 %v421_v0, %v421_v0  ;;  %v424_v3 = vpack.c.bf16 %v422_v1, %v422_v1  ;;  %v1005_v4 = vld [vmem:[%s1285_s5] ss:$0 sm:$0xff] }
  0x1c   : > { %v432_v5 = vadd.f32 %v1005_v4, %v421_v0  ;;  %v433_v6 = vadd.f32 %v1005_v4, %v422_v1 }
  0x1d   : > { %426 = vst.msk [vmem:[#allocation2] sm:$0xf] %vm425_vm0, %v423_v2 }
  0x1e   : > { %427 = vst.msk [vmem:[#allocation2 + $0x4] sm:$0xf] %vm425_vm0, %v424_v3 }
  0x1f   : > { %435 = vst.msk [vmem:[#allocation3] sm:$0xff] %vm434_vm1, %v432_v5 }
  0x20   : > { %436 = vst.msk [vmem:[#allocation3 + $0x8] sm:$0xff] %vm434_vm1, %v433_v6 }
  0x21 PF: > { %v961_v7 = vld [vmem:[%s385_s26 + $0x8] sm:$0xff]  ;;  %v960_v8 = vld [vmem:[%s385_s26] sm:$0xff]  ;;  %vm464_vm2 = vcmask 261120   ;;  %s1297_s22 = scalar_lea.vmem %s1283_s3, %s1174_s18  ;;  %s1082_s29 = smov 120   ;;  %vm486_vm3 = vcmask 64512   ;;  %vm509_vm4 = vcmask 130048  }
  0x22   : > { %474 = vmatpush.bf16.msra.mxu0 %v961_v7  ;;  %v1009_v11 = vld [vmem:[%s1297_s22] ss:$0 sm:$0xff]  ;;  %v1083_v55 = vmov 24   ;;  %s1084_s18 = smov 112   ;;  %p953_p9 = scmp.ne.s32.totalorder %s1064_s13, 3 }
  0x23   : > { %1006 = vset.pattern.permute.xlu1 %v1083_v55  ;;  %1007 = vset.pattern.permute.xlu2 %v1083_v55 }
  0x24   : > { %1008 = vset.pattern.permute.xlu0 %v1083_v55 }
  0x25   : > { %v959_v9 = vld [vmem:[#allocation2] sm:$0xff] }
  0x26   : > { %475 = vmatpush.bf16.msra.mxu0 %v960_v8 }
  0x29   : > { %947 = vmatmul.msk.bf16.vlgmr.msra.gmra.mxu0 %vm464_vm2, %v959_v9 }
  0xa6   : > { %v477_v10 = vpop.f32.mrf.mxu0 }
  0xa7   : > { %v478_v13 = vadd.f32 %v1009_v11, %v477_v10 }
  0xa9   : > { %v532_v24 = vmul.f32 -5.0, %v478_v13 }
  0xab   : > { %v534_v25 = vmul.f32 1.442695, %v532_v24 }
  0xad   : > { %1010 = vpow2.f32 %v534_v25 }
  0xae   : > { %v479_v12 = vpop.f32.mrf.mxu0 }
  0xaf   : > { %v480_v14 = vadd.f32 %v1009_v11, %v479_v12 }
  0xb1   : > { %v1220_v15 = vpack.c.bf16 %v480_v14, %v478_v13  ;;  %v533_v27 = vmul.f32 -5.0, %v480_v14 }
  0xb3   : > { %484 = vrot.lane.b32.xlu0 %v1220_v15, %s1082_s29  ;;  %v1011_v26 = vpop.eup %1010  ;;  %v536_v29 = vmul.f32 1.442695, %v533_v27 }
  0xb4   : > { %v538_v28 = vadd.f32 1.0, %v1011_v26 }
  0xb6   : > { %1012 = vrcp.f32 %v538_v28  ;;  %v551_v38 = vand.u32 2147483648, %v538_v28  ;;  %vm545_vm6 = vweird.f32 %v538_v28  ;;  %v549_v39 = vand.u32 2147483647, %v538_v28 }
  0xb7   : > { %1014 = vpow2.f32 %v536_v29 }
  0xb8   : > { %v552_v42 = vor.u32 1.1754944e-38, %v551_v38  ;;  %vm550_vm8 = vcmp.eq.f32.partialorder %v549_v39, 8.507059e+37 }
  0xbc   : > { %v1013_v30 = vpop.eup %1012 }
  0xbd   : > { %v1015_v31 = vpop.eup %1014  ;;  %v541_v32 = vmul.f32 %v1013_v30, %v538_v28  ;;  %vm546_vm5 = vweird.f32 %v1013_v30 }
  0xbe   : > { %v539_v33 = vadd.f32 1.0, %v1015_v31  ;;  %vm547_vm7 = vmor %vm545_vm6, %vm546_vm5 }
  0xbf   : > { %v542_v34 = vsub.f32 1.0, %v541_v32 }
  0xc0   : > { %1016 = vrcp.f32 %v539_v33  ;;  %v566_v49 = vand.u32 2147483648, %v539_v33  ;;  %vm560_vm10 = vweird.f32 %v539_v33  ;;  %v564_v51 = vand.u32 2147483647, %v539_v33 }
  0xc1   : > { %v543_v35 = vmul.f32 %v1013_v30, %v542_v34 }
  0xc2   : > { %v567_v53 = vor.u32 1.1754944e-38, %v566_v49  ;;  %vm565_vm12 = vcmp.eq.f32.partialorder %v564_v51, 8.507059e+37 }
  0xc3   : > { %v544_v36 = vadd.f32 %v1013_v30, %v543_v35 }
  0xc5   : > { %v548_v40 = vsel %vm547_vm7, %v1013_v30, %v544_v36 }
  0xc6   : > { %v1017_v37 = vpop.eup %1016  ;;  %v553_v43 = vsel %vm550_vm8, %v552_v42, %v548_v40  ;;  %vm642_vm8 = vcmask 125952  }
  0xc7   : > { %v556_v41 = vmul.f32 %v1017_v37, %v539_v33  ;;  %v570_v45 = vadd.f32 1e-05, %v553_v43  ;;  %vm561_vm9 = vweird.f32 %v1017_v37 }
  0xc8   : > { %vm562_vm11 = vmor %vm560_vm10, %vm561_vm9  ;;  %vm681_vm9 = vcmask 1043456  }
  0xc9   : > { %v557_v44 = vsub.f32 1.0, %v556_v41  ;;  %v572_v47 = vmul.f32 1.0986123, %v570_v45 }
  0xcb   : > { %v558_v46 = vmul.f32 %v1017_v37, %v557_v44  ;;  %v574_v50 = vmul.f32 1.442695, %v572_v47  ;;  %v581_v44 = vld [vmem:[%s1281_s1 + $0x8] sm:$0xff] }
  0xcd   : > { %v559_v48 = vadd.f32 %v1017_v37, %v558_v46  ;;  %1018 = vpow2.f32 %v574_v50  ;;  %v580_v46 = vld [vmem:[%s1281_s1] sm:$0xff] }
  0xcf   : > { %v563_v52 = vsel %vm562_vm11, %v1017_v37, %v559_v48 }
  0xd0   : > { %v568_v54 = vsel %vm565_vm12, %v567_v53, %v563_v52 }
  0xd1   : > { %v571_v56 = vadd.f32 1e-05, %v568_v54 }
  0xd3   : > { %v1019_v57 = vpop.eup %1018  ;;  %v573_v58 = vmul.f32 1.0986123, %v571_v56 }
  0xd4   : > { %v949_v59 = vadd.f32 -1.0, %v1019_v57  ;;  %v677_v57 = vld [vmem:[%s1197_s20] sm:$0xf] }
  0xd5   : > { %v576_v60 = vmul.f32 1.442695, %v573_v58  ;;  %v683_v58 = vsel %vm681_vm9, %v677_v57, 0 }
  0xd6   : > { %v582_v62 = vmul.f32 %v949_v59, %v949_v59  ;;  %692 = vmatpush.bf16.msra.mxu3 %v683_v58 }
  0xd7   : > { %1020 = vpow2.f32 %v576_v60 }
  0xd8   : > { %1022 = vrcp.f32 %v582_v62  ;;  %vm589_vm14 = vweird.f32 %v582_v62 }
  0xdd   : > { %v1021_v2 = vpop.eup %1020 }
  0xde   : > { %v1023_v4 = vpop.eup %1022  ;;  %v950_v8 = vadd.f32 -1.0, %v1021_v2 }
  0xdf   : > { %v585_v9 = vmul.f32 %v1023_v4, %v582_v62  ;;  %vm590_vm13 = vweird.f32 %v1023_v4 }
  0xe0   : > { %v583_v10 = vmul.f32 %v950_v8, %v950_v8  ;;  %vm591_vm15 = vmor %vm589_vm14, %vm590_vm13 }
  0xe1   : > { %v586_v11 = vsub.f32 1.0, %v585_v9  ;;  %v675_v9 = vld [vmem:[#allocation3 + $0x8] sm:$0xff] }
  0xe2   : > { %v610_v28 = vand.u32 2147483648, %v583_v10  ;;  %vm604_vm5 = vweird.f32 %v583_v10  ;;  %v608_v29 = vand.u32 2147483647, %v583_v10 }
  0xe3   : > { %v587_v14 = vmul.f32 %v1023_v4, %v586_v11 }
  0xe4   : > { %v611_v31 = vor.u32 1.1754944e-38, %v610_v28  ;;  %vm609_vm7 = vcmp.eq.f32.partialorder %v608_v29, 8.507059e+37 }
 0x125   : > { %v485_v16 = vpop.permute.xlu0 %484 }
 0x126   : > { %v491_v17 = vsel %vm486_vm3, %v485_v16, 0 }
 0x127   : > { %500 = vmatpush.bf16.xpose.msra.mxu1 %v491_v17  ;;  %v588_v17 = vadd.f32 %v1023_v4, %v587_v14 }
 0x12e   : > { %948 = vmatmul.msk.bf16.vlgmr.msra.gmra.mxu1 %vm486_vm3, %v1220_v15 }
 0x1ab   : > { %v502_v18 = vpop.f32.mrf.mxu1 }
 0x1ac   : > { %v1226_v19 = vmul.f32 0.35355338, %v502_v18  ;;  %v595_v18 = vand.u32 2147483648, %v582_v62 }
 0x1ae   : > { %v510_v20 = vsel %vm509_vm4, %v1226_v19, -inf }
 0x1af   : > { %511 = vmax.xlane.f32.xlu0 %v510_v20 }
 0x1b3   : > { %v504_v21 = vpop.f32.mrf.mxu1 }
 0x1b4   : > { %v1230_v22 = vmul.f32 0.35355338, %v504_v21  ;;  %v592_v21 = vsel %vm591_vm15, %v1023_v4, %v588_v17 }
 0x1b6   : > { %v513_v23 = vsel %vm509_vm4, %v1230_v22, -inf }
 0x1b7   : > { %514 = vmax.xlane.f32.xlu1 %v513_v23 }
 0x222   : > { %v512_v61 = vpop.xlane.xlu0 %511 }
 0x223   : > { %v516_v63 = vsub.f32 %v1226_v19, %v512_v61  ;;  %v593_v19 = vand.u32 2147483647, %v582_v62 }
 0x225   : > { %v518_v0 = vmul.f32 1.442695, %v516_v63  ;;  %vm594_vm0 = vcmp.eq.f32.partialorder %v593_v19, 8.507059e+37 }
 0x227   : > { %1024 = vpow2.f32 %v518_v0 }
 0x22a   : > { %v515_v1 = vpop.xlane.xlu1 %514 }
 0x22b   : > { %v517_v3 = vsub.f32 %v1230_v22, %v515_v1  ;;  %v596_v22 = vor.u32 1.1754944e-38, %v595_v18 }
 0x22d   : > { %v1025_v5 = vpop.eup %1024  ;;  %v520_v6 = vmul.f32 1.442695, %v517_v3  ;;  %v597_v23 = vsel %vm594_vm0, %v596_v22, %v592_v21 }
 0x22e   : > { %v522_v7 = vsel %vm509_vm4, %v1025_v5, 0.0  ;;  %v598_v25 = vmul.f32 -0.5, %v597_v23 }
 0x22f   : > { %1026 = vpow2.f32 %v520_v6  ;;  %523 = vadd.xlane.f32.xlu1 %v522_v7  ;;  %v674_v6 = vld [vmem:[#allocation3] sm:$0xff] }
 0x230   : > { %1028 = vrcp.f32 %v583_v10 }
 0x235   : > { %v1027_v12 = vpop.eup %1026 }
 0x236   : > { %v525_v13 = vsel %vm509_vm4, %v1027_v12, 0.0  ;;  %v1029_v16 = vpop.eup %1028 }
 0x237   : > { %526 = vadd.xlane.f32.xlu2 %v525_v13  ;;  %v600_v20 = vmul.f32 %v1029_v16, %v583_v10  ;;  %vm605_vm1 = vweird.f32 %v1029_v16 }
 0x238   : > { %vm606_vm6 = vmor %vm604_vm5, %vm605_vm1 }
 0x239   : > { %v601_v24 = vsub.f32 1.0, %v600_v20 }
 0x23b   : > { %v602_v26 = vmul.f32 %v1029_v16, %v601_v24 }
 0x23d   : > { %v603_v27 = vadd.f32 %v1029_v16, %v602_v26 }
 0x23f   : > { %v607_v30 = vsel %vm606_vm6, %v1029_v16, %v603_v27 }
 0x240   : > { %v612_v32 = vsel %vm609_vm7, %v611_v31, %v607_v30 }
 0x241   : > { %v613_v33 = vmul.f32 -0.5, %v612_v32 }
 0x248   : > { %616 = vperm.xlu1 %1006, %v598_v25  }
 0x24f   : > { %654 = vrot.lane.b32.xlu2 %v1220_v15, %s1084_s18 }
 0x257   : > { %621 = vperm.xlu2 %1007, %v613_v33  }
 0x2a2   : > { %v524_v34 = vpop.xlane.xlu1 %523 }
 0x2a3   : > { %1030 = vrcp.f32 %v524_v34 }
 0x2a9   : > { %v1031_v35 = vpop.eup %1030 }
 0x2aa   : > { %v530_v36 = vmul.f32 %v1031_v35, %v1025_v5  ;;  %v527_v37 = vpop.xlane.xlu2 %526 }
 0x2ab   : > { %1032 = vrcp.f32 %v527_v37 }
 0x2ac   : > { %v640_v38 = vpack.c.bf16 %v530_v36, %v530_v36 }
 0x2ae   : > { %643 = vst.msk [vmem:[%s1203_s27] sm:$0xf] %vm642_vm8, %v640_v38  ;;  %v651_v42 = vunpack.c.l.b16 %v640_v38 }
 0x2b1   : > { %v1033_v39 = vpop.eup %1032 }
 0x2b2   : > { %v531_v40 = vmul.f32 %v1033_v39, %v1027_v12  ;;  %v655_v15 = vpop.permute.xlu2 %654 }
 0x2b3   : > { %667 = vmatpush.bf16.msra.mxu2 %v655_v15 }
 0x2b4   : > { %v641_v41 = vpack.c.bf16 %v531_v40, %v531_v40 }
 0x2b6   : > { %644 = vst.msk [vmem:[%s1203_s27 + $0x4] sm:$0xf] %vm642_vm8, %v641_v41  ;;  %v652_v43 = vunpack.c.l.b16 %v641_v41 }
 0x2b8   : > { %v653_v45 = vpack.c.b16 %v652_v43, %v651_v42 }
 0x2ba   : > { %v622_v47 = vpop.permute.xlu2 %621  ;;  %951 = vmatmul.msk.bf16.vlgmr.msra.gmra.mxu2 %vm509_vm4, %v653_v45  ;;  %v617_v48 = vpop.permute.xlu1 %616 }
 0x2bb   : > { %v625_v49 = vmul.f32 %v622_v47, %v581_v44  ;;  %v624_v50 = vmul.f32 %v617_v48, %v580_v46 }
 0x2bd   : > { %v628_v51 = vmul.f32 1.442695, %v625_v49  ;;  %v626_v52 = vmul.f32 1.442695, %v624_v50 }
 0x2bf   : > { %1034 = vpow2.f32 %v628_v51 }
 0x2c0   : > { %1036 = vpow2.f32 %v626_v52 }
 0x2c5   : > { %v1035_v53 = vpop.eup %1034 }
 0x2c6   : > { %v1037_v54 = vpop.eup %1036  ;;  %v633_v55 = vsel %vm509_vm4, %v1035_v53, 0.0 }
 0x2c7   : > { %634 = vadd.xlane.f32.xlu1 %v633_v55  ;;  %v630_v56 = vsel %vm509_vm4, %v1037_v54, 0.0 }
 0x2c8   : > { %631 = vadd.xlane.f32.xlu2 %v630_v56 }
 0x33a   : > { %v635_v59 = vpop.xlane.xlu1 %634 }
 0x33b   : > { %v632_v60 = vpop.xlane.xlu2 %631  ;;  %1038 = vrcp.f32 %v635_v59 }
 0x33c   : > { %1040 = vrcp.f32 %v632_v60 }
 0x33d   : > { %v669_v61 = vpop.f32.mrf.mxu2 }
 0x341   : > { %v1039_v62 = vpop.eup %1038 }
 0x342   : > { %v1041_v63 = vpop.eup %1040  ;;  %v639_v0 = vmul.f32 %v1039_v62, %v1035_v53 }
 0x343   : > { %v638_v1 = vmul.f32 %v1041_v63, %v1037_v54 }
 0x344   : > { %v646_v2 = vpack.c.bf16 %v639_v0, %v639_v0 }
 0x345   : > { %v645_v3 = vpack.c.bf16 %v638_v1, %v638_v1  ;;  %v671_v4 = vpop.f32.mrf.mxu2 }
 0x346   : > { %648 = vst.msk [vmem:[%s1208_s11 + $0x4] sm:$0xf] %vm642_vm8, %v646_v2  ;;  %v676_v5 = vpack.c.bf16 %v671_v4, %v669_v61 }
 0x347   : > { %647 = vst.msk [vmem:[%s1208_s11] sm:$0xf] %vm642_vm8, %v645_v3 }
 0x348   : > { %952 = vmatmul.msk.bf16.vlgmr.msra.gmra.mxu3 %vm486_vm3, %v676_v5 }
 0x3cb   : > { %v694_v7 = vpop.f32.mrf.mxu3 }
 0x3cc   : > { %v699_v8 = vadd.f32 %v694_v7, %v674_v6 }
 0x3ce   : > { %701 = vst.msk [vmem:[#allocation3] sm:$0xff] %vm464_vm2, %v699_v8 }
 0x3d2   : > { %706 = sbr.rel (%p953_p9) target bundleno = 991 (0x3df), region = 52 }
 0x3d3   : > { %v696_v10 = vpop.f32.mrf.mxu3 }
 0x3d4   : > { %v700_v11 = vadd.f32 %v696_v10, %v675_v9 }
 0x3d6   : > { %702 = vst.msk [vmem:[#allocation3 + $0x8] sm:$0xff] %vm464_vm2, %v700_v11 }
 0x3d7   : > { %v707_v12 = vld [vmem:[#allocation3] sm:$0xff] }
 0x3d8   : > { %709 = vst.msk [vmem:[%s1192_s17] sm:$0xff] %vm464_vm2, %v707_v12 }
 0x3dd   : > { %v708_v13 = vld [vmem:[#allocation3 + $0x8] sm:$0xff] }
 0x3de   : > { %710 = vst.msk [vmem:[%s1192_s17 + $0x8] sm:$0xff] %vm464_vm2, %v708_v13 }
 0x3df PF: > { %s21_s6 = sadd.s32 1, %s1080_s6   ;;  %s1298_s14 = sld [smem:[#allocation4_spill]] }
 0x3e0   : > { %p18_p10 = scmp.ge.s32.totalorder %s21_s6, 10   ;;  %s1299_s20 = sld [smem:[#allocation5_spill]] }
 0x3e1   : > { %s1300_s16 = sld [smem:[#allocation6_spill]]  ;;  %s1301_s13 = smov %s1072_s15 }
 0x3e2   :  { %20 = sbr.rel (!%p18_p10) target bundleno = 3 (0x3), region = 115 }
 0x3e6   : > { %s1302_s15 = smov %s1299_s20 }

// kernel: anomaly_transformer_forward.8
= control target key start
LH: loop header
LB: loop body
LE: loop exit
PB: predicated region body
PF: predicated region fallthrough
CT: control target
= control target key end

     0   :  { %vm53_vm0 = vcmask 261120   ;;  %vm153_vm1 = vcmask 523264   ;;  %s505_s1 = inlined_call_operand.vmem [shape: bf16[32,64], index: 1, kind: input, shape index: {}]   ;;  %s506_s0 = inlined_call_operand.vmem [shape: f32[32,32], index: 0, kind: input, shape index: {}]   ;;  %s507_s2 = inlined_call_operand.vmem [shape: f32[1,64], index: 2, kind: input, shape index: {}]   ;;  %s508_s4 = inlined_call_operand.vmem [shape: f32[1,32], index: 4, kind: input, shape index: {}]   ;;  %s509_s3 = inlined_call_operand.vmem [shape: bf16[64,32], index: 3, kind: input, shape index: {}]   ;;  %s510_s5 = inlined_call_operand.vmem [shape: f32[1,32], index: 5, kind: input, shape index: {}]   ;;  %s511_s6 = inlined_call_operand.vmem [shape: f32[1,32], index: 6, kind: input, shape index: {}]   ;;  %s512_s7 = inlined_call_operand.vmem [shape: f32[32,32], index: 7, kind: output, shape index: {}]  }
   0x1   :  { %v331_v0 = vld [vmem:[%s505_s1 + $0x8] sm:$0xff]  ;;  %v330_v1 = vld [vmem:[%s505_s1] sm:$0xff]  ;;  %v425_v4 = vld [vmem:[%s506_s0 + $0x10] sm:$0xff] }
   0x2   :  { %v415_v2 = vld [vmem:[%s506_s0] sm:$0xff]  ;;  %v420_v3 = vld [vmem:[%s506_s0 + $0x8] sm:$0xff]  ;;  %66 = vmatpush.bf16.msra.mxu0 %v331_v0  ;;  %336 = vmatpush.bf16.msra.mxu3 %v331_v0  ;;  %v430_v5 = vld [vmem:[%s506_s0 + $0x18] sm:$0xff] }
   0x3   :  { %v31_v6 = vpack.c.bf16 %v420_v3, %v415_v2  ;;  %v32_v7 = vpack.c.bf16 %v430_v5, %v425_v4  ;;  %v335_v8 = vld [vmem:[%s509_s3 + $0x18] sm:$0xff]  ;;  %v334_v9 = vld [vmem:[%s509_s3 + $0x10] sm:$0xff]  ;;  %v333_v10 = vld [vmem:[%s509_s3 + $0x8] sm:$0xff] }
   0x4   :  { %164 = vmatpush.bf16.msra.mxu1 %v335_v8  ;;  %338 = vmatpush.bf16.msra.mxu2 %v335_v8  ;;  %v343_v11 = vld [vmem:[%s507_s2] ss:$0 sm:$0xff] }
   0x5   :  { %v332_v12 = vld [vmem:[%s509_s3] sm:$0xff] }
   0x6   :  { %67 = vmatpush.bf16.msra.mxu0 %v330_v1  ;;  %337 = vmatpush.bf16.msra.mxu3 %v330_v1  ;;  %v344_v59 = vld [vmem:[%s508_s4] ss:$0 sm:$0xff] }
   0x8   :  { %165 = vmatpush.bf16.msra.mxu1 %v334_v9  ;;  %339 = vmatpush.bf16.msra.mxu2 %v334_v9 }
   0x9   :  { %310 = vmatmul.msk.bf16.vlgmr.msra.gmra.mxu0 %vm53_vm0, %v31_v6  ;;  %311 = vmatmul.msk.bf16.vlgmr.msra.gmra.mxu3 %vm53_vm0, %v32_v7 }
   0xc   :  { %166 = vmatpush.bf16.msra.mxu1 %v333_v10  ;;  %340 = vmatpush.bf16.msra.mxu2 %v333_v10 }
  0x10   :  { %167 = vmatpush.bf16.msra.mxu1 %v332_v12  ;;  %341 = vmatpush.bf16.msra.mxu2 %v332_v12 }
  0x86   :  { %v69_v13 = vpop.f32.mrf.mxu0 }
  0x87   :  { %v70_v14 = vadd.f32 %v343_v11, %v69_v13 }
  0x89   :  { %v79_v15 = vmul.f32 %v70_v14, %v70_v14 }
  0x8b   :  { %v83_v16 = vmul.f32 %v79_v15, %v70_v14  ;;  %v365_v15 = vmov 32.0  }
  0x8c   :  { %v74_v17 = vpop.f32.mrf.mxu3 }
  0x8d   :  { %v87_v18 = vmul.f32 0.044715, %v83_v16  ;;  %v75_v19 = vadd.f32 %v343_v11, %v74_v17 }
  0x8e   :  { %v71_v20 = vpop.f32.mrf.mxu0 }
  0x8f   :  { %v91_v21 = vadd.f32 %v87_v18, %v70_v14  ;;  %v81_v22 = vmul.f32 %v75_v19, %v75_v19  ;;  %v72_v23 = vadd.f32 %v343_v11, %v71_v20 }
  0x91   :  { %v95_v24 = vmul.f32 0.7978846, %v91_v21  ;;  %v85_v25 = vmul.f32 %v81_v22, %v75_v19  ;;  %v80_v26 = vmul.f32 %v72_v23, %v72_v23 }
  0x93   :  { %v89_v27 = vmul.f32 0.044715, %v85_v25  ;;  %v84_v28 = vmul.f32 %v80_v26, %v72_v23  ;;  %347 = vtanh.f32 %v95_v24 }
  0x94   :  { %v76_v29 = vpop.f32.mrf.mxu3 }
  0x95   :  { %v93_v30 = vadd.f32 %v89_v27, %v75_v19  ;;  %v88_v31 = vmul.f32 0.044715, %v84_v28  ;;  %v77_v32 = vadd.f32 %v343_v11, %v76_v29 }
  0x97   :  { %v97_v33 = vmul.f32 0.7978846, %v93_v30  ;;  %v92_v34 = vadd.f32 %v88_v31, %v72_v23  ;;  %v82_v35 = vmul.f32 %v77_v32, %v77_v32 }
  0x99   :  { %v96_v36 = vmul.f32 0.7978846, %v92_v34  ;;  %v86_v37 = vmul.f32 %v82_v35, %v77_v32  ;;  %349 = vtanh.f32 %v97_v33  ;;  %v348_v38 = vpop.eup %347 }
  0x9a   :  { %v103_v41 = vadd.f32 1.0, %v348_v38 }
  0x9b   :  { %351 = vtanh.f32 %v96_v36  ;;  %v90_v39 = vmul.f32 0.044715, %v86_v37 }
  0x9c   :  { %v107_v46 = vmul.f32 0.5, %v103_v41 }
  0x9d   :  { %v94_v40 = vadd.f32 %v90_v39, %v77_v32 }
  0x9e   :  { %v111_v49 = vmul.f32 %v107_v46, %v70_v14 }
  0x9f   :  { %v98_v42 = vmul.f32 0.7978846, %v94_v40  ;;  %v350_v43 = vpop.eup %349 }
  0xa0   :  { %v105_v48 = vadd.f32 1.0, %v350_v43 }
  0xa1   :  { %v352_v44 = vpop.eup %351  ;;  %353 = vtanh.f32 %v98_v42 }
  0xa2   :  { %v104_v45 = vadd.f32 1.0, %v352_v44  ;;  %v109_v54 = vmul.f32 0.5, %v105_v48  ;;  %355 = vrcp.f32 %v365_v15 }
  0xa4   :  { %v108_v47 = vmul.f32 0.5, %v104_v45  ;;  %v113_v56 = vmul.f32 %v109_v54, %v75_v19 }
  0xa6   :  { %v112_v50 = vmul.f32 %v108_v47, %v72_v23 }
  0xa7   :  { %v354_v51 = vpop.eup %353 }
  0xa8   :  { %v115_v52 = vpack.c.bf16 %v112_v50, %v111_v49  ;;  %v106_v53 = vadd.f32 1.0, %v354_v51 }
  0xaa   :  { %328 = vmatmul.msk.bf16.vlgmr.msra.gmra.mxu1 %vm153_vm1, %v115_v52  ;;  %v110_v55 = vmul.f32 0.5, %v106_v53 }
  0xac   :  { %v114_v57 = vmul.f32 %v110_v55, %v77_v32 }
  0xae   :  { %v116_v58 = vpack.c.bf16 %v114_v57, %v113_v56  ;;  %v345_v57 = vld [vmem:[%s510_s5] ss:$0 sm:$0xff] }
  0xb0   :  { %329 = vmatmul.msk.bf16.vlgmr.msra.gmra.mxu2 %vm153_vm1, %v116_v58 }
 0x127   :  { %v169_v60 = vpop.f32.mrf.mxu1 }
 0x128   :  { %v170_v61 = vadd.f32 %v344_v59, %v169_v60 }
 0x12a   :  { %v179_v62 = vadd.f32 %v170_v61, %v415_v2 }
 0x12c   :  { %v183_v63 = vsel %vm53_vm0, %v179_v62, 0.0 }
 0x12d   :  { %184 = vadd.xlane.f32.xlu0 %v183_v63 }
 0x12f   :  { %v171_v0 = vpop.f32.mrf.mxu1 }
 0x130   :  { %v172_v1 = vadd.f32 %v344_v59, %v171_v0 }
 0x132   :  { %v180_v6 = vadd.f32 %v172_v1, %v420_v3  ;;  %v356_v3 = vpop.eup %355 }
 0x133   :  { %v174_v7 = vpop.f32.mrf.mxu2  ;;  %v196_v16 = vmul.f32 32.0, %v356_v3  ;;  %vm200_vm2 = vweird.f32 %v356_v3 }
 0x134   :  { %v175_v8 = vadd.f32 %v344_v59, %v174_v7  ;;  %v186_v9 = vsel %vm53_vm0, %v180_v6, 0.0 }
 0x135   :  { %187 = vadd.xlane.f32.xlu0 %v186_v9  ;;  %v197_v17 = vsub.f32 1.0, %v196_v16 }
 0x136   :  { %v181_v10 = vadd.f32 %v175_v8, %v425_v4 }
 0x137   :  { %v198_v18 = vmul.f32 %v356_v3, %v197_v17 }
 0x138   :  { %v189_v11 = vsel %vm53_vm0, %v181_v10, 0.0 }
 0x139   :  { %190 = vadd.xlane.f32.xlu1 %v189_v11  ;;  %v199_v19 = vadd.f32 %v356_v3, %v198_v18 }
 0x13b   :  { %v176_v12 = vpop.f32.mrf.mxu2  ;;  %v201_v20 = vsel %vm200_vm2, %v356_v3, %v199_v19 }
 0x13c   :  { %v177_v13 = vadd.f32 %v344_v59, %v176_v12 }
 0x13e   :  { %v182_v2 = vadd.f32 %v177_v13, %v430_v5 }
 0x140   :  { %v192_v14 = vsel %vm53_vm0, %v182_v2, 0.0 }
 0x141   :  { %193 = vadd.xlane.f32.xlu1 %v192_v14 }
 0x1a0   :  { %v185_v4 = vpop.xlane.xlu0 %184 }
 0x1a1   :  { %v202_v21 = vmul.f32 %v201_v20, %v185_v4 }
 0x1a3   :  { %v206_v22 = vsub.f32 %v179_v62, %v202_v21  ;;  %v346_v62 = vld [vmem:[%s511_s6] ss:$0 sm:$0xff] }
 0x1a5   :  { %v210_v23 = vmul.f32 %v206_v22, %v206_v22 }
 0x1a7   :  { %v214_v24 = vsel %vm53_vm0, %v210_v23, 0.0 }
 0x1a8   :  { %215 = vadd.xlane.f32.xlu2 %v214_v24  ;;  %v188_v5 = vpop.xlane.xlu0 %187 }
 0x1a9   :  { %v203_v25 = vmul.f32 %v201_v20, %v188_v5 }
 0x1ab   :  { %v465_v26 = vsub.f32 %v180_v6, %v203_v25 }
 0x1ac   :  { %v191_v27 = vpop.xlane.xlu1 %190 }
 0x1ad   :  { %v204_v28 = vmul.f32 %v201_v20, %v191_v27  ;;  %v211_v29 = vmul.f32 %v465_v26, %v465_v26 }
 0x1af   :  { %v469_v30 = vsub.f32 %v181_v10, %v204_v28  ;;  %v217_v31 = vsel %vm53_vm0, %v211_v29, 0.0 }
 0x1b0   :  { %218 = vadd.xlane.f32.xlu2 %v217_v31 }
 0x1b1   :  { %v212_v32 = vmul.f32 %v469_v30, %v469_v30 }
 0x1b3   :  { %v220_v33 = vsel %vm53_vm0, %v212_v32, 0.0 }
 0x1b4   :  { %v194_v34 = vpop.xlane.xlu1 %193  ;;  %221 = vadd.xlane.f32.xlu0 %v220_v33 }
 0x1b5   :  { %v205_v35 = vmul.f32 %v201_v20, %v194_v34 }
 0x1b7   :  { %v475_v36 = vsub.f32 %v182_v2, %v205_v35 }
 0x1b9   :  { %v213_v37 = vmul.f32 %v475_v36, %v475_v36 }
 0x1bb   :  { %v223_v38 = vsel %vm53_vm0, %v213_v37, 0.0 }
 0x1bc   :  { %224 = vadd.xlane.f32.xlu1 %v223_v38 }
 0x21b   :  { %v216_v39 = vpop.xlane.xlu2 %215 }
 0x21c   :  { %v226_v40 = vmul.f32 %v216_v39, %v201_v20 }
 0x21e   :  { %v230_v41 = vadd.f32 1e-05, %v226_v40 }
 0x220   :  { %357 = vrsqrt.f32 %v230_v41  ;;  %vm240_vm4 = vweird.f32 %v230_v41 }
 0x223   :  { %v219_v42 = vpop.xlane.xlu2 %218 }
 0x224   :  { %v227_v43 = vmul.f32 %v219_v42, %v201_v20 }
 0x226   :  { %v358_v44 = vpop.eup %357  ;;  %v231_v45 = vadd.f32 1e-05, %v227_v43 }
 0x227   :  { %v235_v46 = vmul.f32 %v358_v44, %v230_v41  ;;  %v222_v47 = vpop.xlane.xlu0 %221  ;;  %vm241_vm3 = vweird.f32 %v358_v44 }
 0x228   :  { %359 = vrsqrt.f32 %v231_v45  ;;  %v228_v48 = vmul.f32 %v222_v47, %v201_v20  ;;  %vm242_vm5 = vmor %vm240_vm4, %vm241_vm3  ;;  %vm250_vm7 = vweird.f32 %v231_v45 }
 0x229   :  { %v236_v49 = vmul.f32 %v358_v44, %v235_v46 }
 0x22a   :  { %v232_v50 = vadd.f32 1e-05, %v228_v48 }
 0x22b   :  { %v237_v51 = vmul.f32 0.5, %v236_v49 }
 0x22c   :  { %361 = vrsqrt.f32 %v232_v50  ;;  %vm260_vm10 = vweird.f32 %v232_v50 }
 0x22d   :  { %v238_v52 = vsub.f32 1.5, %v237_v51 }
 0x22e   :  { %v360_v53 = vpop.eup %359 }
 0x22f   :  { %v239_v54 = vmul.f32 %v358_v44, %v238_v52  ;;  %v245_v55 = vmul.f32 %v360_v53, %v231_v45  ;;  %v225_v56 = vpop.xlane.xlu1 %224  ;;  %vm251_vm6 = vweird.f32 %v360_v53 }
 0x230   :  { %v229_v58 = vmul.f32 %v225_v56, %v201_v20  ;;  %vm252_vm8 = vmor %vm250_vm7, %vm251_vm6 }
 0x231   :  { %v243_v59 = vsel %vm242_vm5, %v358_v44, %v239_v54  ;;  %v246_v60 = vmul.f32 %v360_v53, %v245_v55 }
 0x232   :  { %v362_v61 = vpop.eup %361  ;;  %v274_v63 = vmul.f32 %v243_v59, %v206_v22  ;;  %v233_v0 = vadd.f32 1e-05, %v229_v58 }
 0x233   :  { %v247_v1 = vmul.f32 0.5, %v246_v60  ;;  %v255_v6 = vmul.f32 %v362_v61, %v232_v50  ;;  %vm261_vm9 = vweird.f32 %v362_v61 }
 0x234   :  { %v282_v7 = vmul.f32 %v345_v57, %v274_v63  ;;  %363 = vrsqrt.f32 %v233_v0  ;;  %vm262_vm11 = vmor %vm260_vm10, %vm261_vm9  ;;  %vm270_vm13 = vweird.f32 %v233_v0 }
 0x235   :  { %v248_v8 = vsub.f32 1.5, %v247_v1  ;;  %v256_v9 = vmul.f32 %v362_v61, %v255_v6 }
 0x236   :  { %v290_v10 = vadd.f32 %v346_v62, %v282_v7 }
 0x237   :  { %v249_v11 = vmul.f32 %v360_v53, %v248_v8  ;;  %v257_v12 = vmul.f32 0.5, %v256_v9 }
 0x238   :  { %294 = vst.msk [vmem:[%s512_s7] sm:$0xff] %vm53_vm0, %v290_v10 }
 0x239   :  { %v253_v13 = vsel %vm252_vm8, %v360_v53, %v249_v11  ;;  %v258_v2 = vsub.f32 1.5, %v257_v12 }
 0x23a   :  { %v364_v14 = vpop.eup %363  ;;  %v275_v15 = vmul.f32 %v253_v13, %v465_v26 }
 0x23b   :  { %v259_v3 = vmul.f32 %v362_v61, %v258_v2  ;;  %v265_v16 = vmul.f32 %v364_v14, %v233_v0  ;;  %vm271_vm12 = vweird.f32 %v364_v14 }
 0x23c   :  { %v283_v17 = vmul.f32 %v345_v57, %v275_v15  ;;  %vm272_vm14 = vmor %vm270_vm13, %vm271_vm12 }
 0x23d   :  { %v263_v18 = vsel %vm262_vm11, %v362_v61, %v259_v3  ;;  %v266_v19 = vmul.f32 %v364_v14, %v265_v16 }
 0x23e   :  { %v291_v20 = vadd.f32 %v346_v62, %v283_v17  ;;  %v276_v4 = vmul.f32 %v263_v18, %v469_v30 }
 0x23f   :  { %v267_v21 = vmul.f32 0.5, %v266_v19 }
 0x240   :  { %295 = vst.msk [vmem:[%s512_s7 + $0x8] sm:$0xff] %vm53_vm0, %v291_v20  ;;  %v284_v22 = vmul.f32 %v345_v57, %v276_v4 }
 0x241   :  { %v268_v23 = vsub.f32 1.5, %v267_v21 }
 0x242   :  { %v292_v24 = vadd.f32 %v346_v62, %v284_v22 }
 0x243   :  { %v269_v5 = vmul.f32 %v364_v14, %v268_v23 }
 0x244   :  { %296 = vst.msk [vmem:[%s512_s7 + $0x10] sm:$0xff] %vm53_vm0, %v292_v24 }
 0x245   :  { %v273_v25 = vsel %vm272_vm14, %v364_v14, %v269_v5 }
 0x246   :  { %v277_v26 = vmul.f32 %v273_v25, %v475_v36 }
 0x248   :  { %v285_v27 = vmul.f32 %v345_v57, %v277_v26 }
 0x24a   :  { %v293_v28 = vadd.f32 %v346_v62, %v285_v27 }
 0x24c   :  { %297 = vst.msk [vmem:[%s512_s7 + $0x18] sm:$0xff] %vm53_vm0, %v293_v28 }

// kernel: anomaly_transformer_forward.9
= control target key start
LH: loop header
LB: loop body
LE: loop exit
PB: predicated region body
PF: predicated region fallthrough
CT: control target
= control target key end

     0   :  { %s1157_s13 = smov 0   ;;  %s1159_s14 = smov 0   ;;  %s1296_s0 = inlined_call_operand.vmem [shape: f32[2,16,32], index: 0, kind: input, shape index: {}]   ;;  %s1297_s1 = inlined_call_operand.vmem [shape: f32[16,16], index: 1, kind: input, shape index: {}]   ;;  %s1298_s2 = inlined_call_operand.vmem [shape: bf16[4,32,25], index: 2, kind: input, shape index: {}]   ;;  %s1299_s3 = inlined_call_operand.vmem [shape: f32[4,1,25], index: 3, kind: input, shape index: {}]   ;;  %s1300_s4 = inlined_call_operand.vmem [shape: bf16[4,8,32], index: 4, kind: input, shape index: {}]   ;;  %s1301_s5 = inlined_call_operand.vmem [shape: f32[1,32], index: 5, kind: input, shape index: {}]   ;;  %s1302_s6 = inlined_call_operand.vmem [shape: bf16[2,8,16,16], index: 6, kind: input, shape index: {}, may-alias: {6,9}]   ;;  %s1303_s7 = inlined_call_operand.vmem [shape: bf16[2,8,16,16], index: 7, kind: input, shape index: {}, may-alias: {7,10}]   ;;  %s1304_s8 = inlined_call_operand.vmem [shape: f32[2,16,32], index: 8, kind: output, shape index: {0}]   ;;  %s1305_s9 = inlined_call_operand.vmem [shape: bf16[2,8,16,16], index: 9, kind: output, shape index: {1}, may-alias: {6,9}]   ;;  %s1306_s10 = inlined_call_operand.vmem [shape: bf16[2,8,16,16], index: 10, kind: output, shape index: {2}, may-alias: {7,10}]  }
   0x1   :  { %1308 = sst [smem:[#allocation7_spill]] %s1296_s0  ;;  %s1161_s15 = smov 0  }
   0x2   :  { %s1163_s16 = smov 0   ;;  %s1165_s6 = smov 0  }
   0x3 LB: > { %1309 = sst [smem:[#allocation4_spill]] %s1093_s16  ;;  %s30_s7 = sadd.s32 1, %s1089_s15  ;;  %s1097_s6 = sphi %s1165_s6, %s21_s6   ;;  %s1093_s16 = sphi %s1163_s16, %s1316_s16   ;;  %s1089_s15 = sphi %s1161_s15, %s1318_s15   ;;  %s1085_s14 = sphi %s1159_s14, %s1314_s14   ;;  %s1081_s13 = sphi %s1157_s13, %s1317_s13  }
   0x4   : > { %s33_s17 = sadd.s32 1, %s1093_s16  ;;  %p31_p0 = scmp.ge.s32.totalorder %s30_s7, 4 }
   0x5   : > { %p937_p1 = scmp.ge.s32.totalorder %s1097_s6, 1  ;;  %p316_p2 = scmp.lt.s32.totalorder %s1097_s6, 9 }
   0x6   : > { %s1320_s7 = smov (%p31_p0, %s30_s7), 0  ;;  %s1322_s17 = smov (!%p31_p0, %s33_s17), %s1093_s16 }
   0x7   : > { %1310 = sst [smem:[#allocation5_spill]] %s1320_s7  ;;  %p317_p3 = pnand %p937_p1, %p316_p2 }
   0x8   : > { %p35_p4 = scmp.ge.s32.totalorder %s1322_s17, 2  ;;  %p382_p5 = scmp.lt.s32.totalorder (!%p317_p3), %s1085_s14, 1 }
   0x9   : > { %320 = sbr.rel (%p317_p3) target bundleno = 990 (0x3de), region = 44  ;;  %p387_p6 = scmp.lt.s32.totalorder (!%p317_p3), %s1081_s13, 3 }
   0xa   : > { %s1324_s17 = smov (%p35_p4, %s1322_s17), 0  ;;  %s404_s18 = sadd.s32 (!%p317_p3), 4, %s1081_s13 }
   0xb   : > { %1311 = sst [smem:[#allocation6_spill]] %s1324_s17  ;;  %p407_p7 = scmp.lt.s32.totalorder (!%p317_p3), %s404_s18, 7 }
   0xc   : > { %s1312_s0 = sld [smem:[#allocation7_spill]] (!%p317_p3)  ;;  %p951_p8 = scmp.ne.s32.totalorder (!%p317_p3), %s1081_s13, 0 }
   0xe   : > { %s1326_s14 = smov (!%p382_p5, %s1085_s14), 1  ;;  %s1328_s18 = smov (!%p407_p7, %s404_s18), 7 }
   0xf   : > { %s1192_s19 = scalar_select %p387_p6, %s1081_s13, 3 }
  0x10   : > { %s973_s20 = sshll.u32 %s1326_s14, 4  ;;  %s945_s22 = sshll.u32 %s1328_s18, 1 }
  0x11   : > { %s974_s24 = sshll.u32 %s1192_s19, 4  ;;  %s942_s11 = sshll.u32 %s1192_s19, 2 }
  0x12   : > { %s386_s23 = scalar_lea.vmem %s1312_s0, %s973_s20  ;;  %s391_s27 = scalar_lea.vmem %s1298_s2, %s974_s24 }
  0x13   : > { %s1209_s7 = scalar_lea.vmem %s1304_s8, %s973_s20  ;;  %s1214_s21 = scalar_lea.vmem %s1300_s4, %s942_s11 }
  0x14   : > { %s411_s0 = sadd.s32 %s973_s20, %s945_s22  ;;  %430 = sbr.rel (%p951_p8) target bundleno = 32 (0x20), region = 48 }
  0x15   : > { %s947_s25 = sshll.u32 %s411_s0, 2 }
  0x16   : > { %s1219_s28 = scalar_lea.vmem %s1305_s9, %s947_s25  ;;  %s1224_s17 = scalar_lea.vmem %s1306_s10, %s947_s25 }
  0x19   : > { %v431_v0 = vld [vmem:[%s386_s23] sm:$0xff]  ;;  %vm435_vm0 = vcmask 257024   ;;  %v432_v1 = vld [vmem:[%s386_s23 + $0x8] sm:$0xff]  ;;  %vm444_vm1 = vcmask 261120  }
  0x1a   : > { %v433_v2 = vpack.c.bf16 %v431_v0, %v431_v0  ;;  %v434_v3 = vpack.c.bf16 %v432_v1, %v432_v1  ;;  %v1022_v4 = vld [vmem:[%s1301_s5] ss:$0 sm:$0xff] }
  0x1b   : > { %v442_v5 = vadd.f32 %v1022_v4, %v431_v0  ;;  %v443_v6 = vadd.f32 %v1022_v4, %v432_v1 }
  0x1c   : > { %436 = vst.msk [vmem:[#allocation2] sm:$0xf] %vm435_vm0, %v433_v2 }
  0x1d   : > { %437 = vst.msk [vmem:[#allocation2 + $0x4] sm:$0xf] %vm435_vm0, %v434_v3 }
  0x1e   : > { %445 = vst.msk [vmem:[#allocation3] sm:$0xff] %vm444_vm1, %v442_v5 }
  0x1f   : > { %446 = vst.msk [vmem:[#allocation3 + $0x8] sm:$0xff] %vm444_vm1, %v443_v6 }
  0x20 PF: > { %v978_v7 = vld [vmem:[%s391_s27 + $0x8] sm:$0xff]  ;;  %v977_v8 = vld [vmem:[%s391_s27] sm:$0xff]  ;;  %vm474_vm2 = vcmask 261120   ;;  %s1313_s23 = scalar_lea.vmem %s1299_s3, %s1192_s19  ;;  %s1099_s30 = smov 120   ;;  %vm496_vm3 = vcmask 64512   ;;  %vm519_vm4 = vcmask 130048  }
  0x21   : > { %484 = vmatpush.bf16.msra.mxu0 %v978_v7  ;;  %v1026_v11 = vld [vmem:[%s1313_s23] ss:$0 sm:$0xff]  ;;  %v1100_v55 = vmov 24   ;;  %s1101_s19 = smov 112   ;;  %p970_p9 = scmp.ne.s32.totalorder %s1081_s13, 3 }
  0x22   : > { %1023 = vset.pattern.permute.xlu1 %v1100_v55  ;;  %1024 = vset.pattern.permute.xlu2 %v1100_v55 }
  0x23   : > { %1025 = vset.pattern.permute.xlu0 %v1100_v55 }
  0x24   : > { %v976_v9 = vld [vmem:[#allocation2] sm:$0xff] }
  0x25   : > { %485 = vmatpush.bf16.msra.mxu0 %v977_v8 }
  0x28   : > { %964 = vmatmul.msk.bf16.vlgmr.msra.gmra.mxu0 %vm474_vm2, %v976_v9 }
  0xa5   : > { %v487_v10 = vpop.f32.mrf.mxu0 }
  0xa6   : > { %v488_v13 = vadd.f32 %v1026_v11, %v487_v10 }
  0xa8   : > { %v542_v24 = vmul.f32 -5.0, %v488_v13 }
  0xaa   : > { %v544_v25 = vmul.f32 1.442695, %v542_v24 }
  0xac   : > { %1027 = vpow2.f32 %v544_v25 }
  0xad   : > { %v489_v12 = vpop.f32.mrf.mxu0 }
  0xae   : > { %v490_v14 = vadd.f32 %v1026_v11, %v489_v12 }
  0xb0   : > { %v1236_v15 = vpack.c.bf16 %v490_v14, %v488_v13  ;;  %v543_v27 = vmul.f32 -5.0, %v490_v14 }
  0xb2   : > { %494 = vrot.lane.b32.xlu0 %v1236_v15, %s1099_s30  ;;  %v1028_v26 = vpop.eup %1027  ;;  %v546_v29 = vmul.f32 1.442695, %v543_v27 }
  0xb3   : > { %v548_v28 = vadd.f32 1.0, %v1028_v26 }
  0xb5   : > { %1029 = vrcp.f32 %v548_v28  ;;  %v561_v38 = vand.u32 2147483648, %v548_v28  ;;  %vm555_vm6 = vweird.f32 %v548_v28  ;;  %v559_v39 = vand.u32 2147483647, %v548_v28 }
  0xb6   : > { %1031 = vpow2.f32 %v546_v29 }
  0xb7   : > { %v562_v42 = vor.u32 1.1754944e-38, %v561_v38  ;;  %vm560_vm8 = vcmp.eq.f32.partialorder %v559_v39, 8.507059e+37 }
  0xbb   : > { %v1030_v30 = vpop.eup %1029 }
  0xbc   : > { %v1032_v31 = vpop.eup %1031  ;;  %v551_v32 = vmul.f32 %v1030_v30, %v548_v28  ;;  %vm556_vm5 = vweird.f32 %v1030_v30 }
  0xbd   : > { %v549_v33 = vadd.f32 1.0, %v1032_v31  ;;  %vm557_vm7 = vmor %vm555_vm6, %vm556_vm5 }
  0xbe   : > { %v552_v34 = vsub.f32 1.0, %v551_v32 }
  0xbf   : > { %1033 = vrcp.f32 %v549_v33  ;;  %v576_v49 = vand.u32 2147483648, %v549_v33  ;;  %vm570_vm10 = vweird.f32 %v549_v33  ;;  %v574_v51 = vand.u32 2147483647, %v549_v33 }
  0xc0   : > { %v553_v35 = vmul.f32 %v1030_v30, %v552_v34 }
  0xc1   : > { %v577_v53 = vor.u32 1.1754944e-38, %v576_v49  ;;  %vm575_vm12 = vcmp.eq.f32.partialorder %v574_v51, 8.507059e+37 }
  0xc2   : > { %v554_v36 = vadd.f32 %v1030_v30, %v553_v35 }
  0xc4   : > { %v558_v40 = vsel %vm557_vm7, %v1030_v30, %v554_v36 }
  0xc5   : > { %v1034_v37 = vpop.eup %1033  ;;  %v563_v43 = vsel %vm560_vm8, %v562_v42, %v558_v40  ;;  %vm652_vm8 = vcmask 125952  }
  0xc6   : > { %v566_v41 = vmul.f32 %v1034_v37, %v549_v33  ;;  %v580_v45 = vadd.f32 1e-05, %v563_v43  ;;  %vm571_vm9 = vweird.f32 %v1034_v37 }
  0xc7   : > { %vm572_vm11 = vmor %vm570_vm10, %vm571_vm9  ;;  %vm691_vm9 = vcmask 1043456  }
  0xc8   : > { %v567_v44 = vsub.f32 1.0, %v566_v41  ;;  %v582_v47 = vmul.f32 1.0986123, %v580_v45 }
  0xca   : > { %v568_v46 = vmul.f32 %v1034_v37, %v567_v44  ;;  %v584_v50 = vmul.f32 1.442695, %v582_v47  ;;  %v591_v44 = vld [vmem:[%s1297_s1 + $0x8] sm:$0xff] }
  0xcc   : > { %v569_v48 = vadd.f32 %v1034_v37, %v568_v46  ;;  %1035 = vpow2.f32 %v584_v50  ;;  %v590_v46 = vld [vmem:[%s1297_s1] sm:$0xff] }
  0xce   : > { %v573_v52 = vsel %vm572_vm11, %v1034_v37, %v569_v48 }
  0xcf   : > { %v578_v54 = vsel %vm575_vm12, %v577_v53, %v573_v52 }
  0xd0   : > { %v581_v56 = vadd.f32 1e-05, %v578_v54 }
  0xd2   : > { %v1036_v57 = vpop.eup %1035  ;;  %v583_v58 = vmul.f32 1.0986123, %v581_v56 }
  0xd3   : > { %v966_v59 = vadd.f32 -1.0, %v1036_v57  ;;  %v687_v57 = vld [vmem:[%s1214_s21] sm:$0xf] }
  0xd4   : > { %v586_v60 = vmul.f32 1.442695, %v583_v58  ;;  %v693_v58 = vsel %vm691_vm9, %v687_v57, 0 }
  0xd5   : > { %v592_v62 = vmul.f32 %v966_v59, %v966_v59  ;;  %702 = vmatpush.bf16.msra.mxu3 %v693_v58 }
  0xd6   : > { %1037 = vpow2.f32 %v586_v60 }
  0xd7   : > { %1039 = vrcp.f32 %v592_v62  ;;  %vm599_vm14 = vweird.f32 %v592_v62 }
  0xdc   : > { %v1038_v2 = vpop.eup %1037 }
  0xdd   : > { %v1040_v4 = vpop.eup %1039  ;;  %v967_v8 = vadd.f32 -1.0, %v1038_v2 }
  0xde   : > { %v595_v9 = vmul.f32 %v1040_v4, %v592_v62  ;;  %vm600_vm13 = vweird.f32 %v1040_v4 }
  0xdf   : > { %v593_v10 = vmul.f32 %v967_v8, %v967_v8  ;;  %vm601_vm15 = vmor %vm599_vm14, %vm600_vm13 }
  0xe0   : > { %v596_v11 = vsub.f32 1.0, %v595_v9  ;;  %v685_v9 = vld [vmem:[#allocation3 + $0x8] sm:$0xff] }
  0xe1   : > { %v620_v28 = vand.u32 2147483648, %v593_v10  ;;  %vm614_vm5 = vweird.f32 %v593_v10  ;;  %v618_v29 = vand.u32 2147483647, %v593_v10 }
  0xe2   : > { %v597_v14 = vmul.f32 %v1040_v4, %v596_v11 }
  0xe3   : > { %v621_v31 = vor.u32 1.1754944e-38, %v620_v28  ;;  %vm619_vm7 = vcmp.eq.f32.partialorder %v618_v29, 8.507059e+37 }
 0x124   : > { %v495_v16 = vpop.permute.xlu0 %494 }
 0x125   : > { %v501_v17 = vsel %vm496_vm3, %v495_v16, 0 }
 0x126   : > { %510 = vmatpush.bf16.xpose.msra.mxu1 %v501_v17  ;;  %v598_v17 = vadd.f32 %v1040_v4, %v597_v14 }
 0x12d   : > { %965 = vmatmul.msk.bf16.vlgmr.msra.gmra.mxu1 %vm496_vm3, %v1236_v15 }
 0x1aa   : > { %v512_v18 = vpop.f32.mrf.mxu1 }
 0x1ab   : > { %v1242_v19 = vmul.f32 0.35355338, %v512_v18  ;;  %v605_v18 = vand.u32 2147483648, %v592_v62 }
 0x1ad   : > { %v520_v20 = vsel %vm519_vm4, %v1242_v19, -inf }
 0x1ae   : > { %521 = vmax.xlane.f32.xlu0 %v520_v20 }
 0x1b2   : > { %v514_v21 = vpop.f32.mrf.mxu1 }
 0x1b3   : > { %v1246_v22 = vmul.f32 0.35355338, %v514_v21  ;;  %v602_v21 = vsel %vm601_vm15, %v1040_v4, %v598_v17 }
 0x1b5   : > { %v523_v23 = vsel %vm519_vm4, %v1246_v22, -inf }
 0x1b6   : > { %524 = vmax.xlane.f32.xlu1 %v523_v23 }
 0x221   : > { %v522_v61 = vpop.xlane.xlu0 %521 }
 0x222   : > { %v526_v63 = vsub.f32 %v1242_v19, %v522_v61  ;;  %v603_v19 = vand.u32 2147483647, %v592_v62 }
 0x224   : > { %v528_v0 = vmul.f32 1.442695, %v526_v63  ;;  %vm604_vm0 = vcmp.eq.f32.partialorder %v603_v19, 8.507059e+37 }
 0x226   : > { %1041 = vpow2.f32 %v528_v0 }
 0x229   : > { %v525_v1 = vpop.xlane.xlu1 %524 }
 0x22a   : > { %v527_v3 = vsub.f32 %v1246_v22, %v525_v1  ;;  %v606_v22 = vor.u32 1.1754944e-38, %v605_v18 }
 0x22c   : > { %v1042_v5 = vpop.eup %1041  ;;  %v530_v6 = vmul.f32 1.442695, %v527_v3  ;;  %v607_v23 = vsel %vm604_vm0, %v606_v22, %v602_v21 }
 0x22d   : > { %v532_v7 = vsel %vm519_vm4, %v1042_v5, 0.0  ;;  %v608_v25 = vmul.f32 -0.5, %v607_v23 }
 0x22e   : > { %1043 = vpow2.f32 %v530_v6  ;;  %533 = vadd.xlane.f32.xlu1 %v532_v7  ;;  %v684_v6 = vld [vmem:[#allocation3] sm:$0xff] }
 0x22f   : > { %1045 = vrcp.f32 %v593_v10 }
 0x234   : > { %v1044_v12 = vpop.eup %1043 }
 0x235   : > { %v535_v13 = vsel %vm519_vm4, %v1044_v12, 0.0  ;;  %v1046_v16 = vpop.eup %1045 }
 0x236   : > { %536 = vadd.xlane.f32.xlu2 %v535_v13  ;;  %v610_v20 = vmul.f32 %v1046_v16, %v593_v10  ;;  %vm615_vm1 = vweird.f32 %v1046_v16 }
 0x237   : > { %vm616_vm6 = vmor %vm614_vm5, %vm615_vm1 }
 0x238   : > { %v611_v24 = vsub.f32 1.0, %v610_v20 }
 0x23a   : > { %v612_v26 = vmul.f32 %v1046_v16, %v611_v24 }
 0x23c   : > { %v613_v27 = vadd.f32 %v1046_v16, %v612_v26 }
 0x23e   : > { %v617_v30 = vsel %vm616_vm6, %v1046_v16, %v613_v27 }
 0x23f   : > { %v622_v32 = vsel %vm619_vm7, %v621_v31, %v617_v30 }
 0x240   : > { %v623_v33 = vmul.f32 -0.5, %v622_v32 }
 0x247   : > { %626 = vperm.xlu1 %1023, %v608_v25  }
 0x24e   : > { %664 = vrot.lane.b32.xlu2 %v1236_v15, %s1101_s19 }
 0x256   : > { %631 = vperm.xlu2 %1024, %v623_v33  }
 0x2a1   : > { %v534_v34 = vpop.xlane.xlu1 %533 }
 0x2a2   : > { %1047 = vrcp.f32 %v534_v34 }
 0x2a8   : > { %v1048_v35 = vpop.eup %1047 }
 0x2a9   : > { %v540_v36 = vmul.f32 %v1048_v35, %v1042_v5  ;;  %v537_v37 = vpop.xlane.xlu2 %536 }
 0x2aa   : > { %1049 = vrcp.f32 %v537_v37 }
 0x2ab   : > { %v650_v38 = vpack.c.bf16 %v540_v36, %v540_v36 }
 0x2ad   : > { %653 = vst.msk [vmem:[%s1219_s28] sm:$0xf] %vm652_vm8, %v650_v38  ;;  %v661_v42 = vunpack.c.l.b16 %v650_v38 }
 0x2b0   : > { %v1050_v39 = vpop.eup %1049 }
 0x2b1   : > { %v541_v40 = vmul.f32 %v1050_v39, %v1044_v12  ;;  %v665_v15 = vpop.permute.xlu2 %664 }
 0x2b2   : > { %677 = vmatpush.bf16.msra.mxu2 %v665_v15 }
 0x2b3   : > { %v651_v41 = vpack.c.bf16 %v541_v40, %v541_v40 }
 0x2b5   : > { %654 = vst.msk [vmem:[%s1219_s28 + $0x4] sm:$0xf] %vm652_vm8, %v651_v41  ;;  %v662_v43 = vunpack.c.l.b16 %v651_v41 }
 0x2b7   : > { %v663_v45 = vpack.c.b16 %v662_v43, %v661_v42 }
 0x2b9   : > { %v632_v47 = vpop.permute.xlu2 %631  ;;  %968 = vmatmul.msk.bf16.vlgmr.msra.gmra.mxu2 %vm519_vm4, %v663_v45  ;;  %v627_v48 = vpop.permute.xlu1 %626 }
 0x2ba   : > { %v635_v49 = vmul.f32 %v632_v47, %v591_v44  ;;  %v634_v50 = vmul.f32 %v627_v48, %v590_v46 }
 0x2bc   : > { %v638_v51 = vmul.f32 1.442695, %v635_v49  ;;  %v636_v52 = vmul.f32 1.442695, %v634_v50 }
 0x2be   : > { %1051 = vpow2.f32 %v638_v51 }
 0x2bf   : > { %1053 = vpow2.f32 %v636_v52 }
 0x2c4   : > { %v1052_v53 = vpop.eup %1051 }
 0x2c5   : > { %v1054_v54 = vpop.eup %1053  ;;  %v643_v55 = vsel %vm519_vm4, %v1052_v53, 0.0 }
 0x2c6   : > { %644 = vadd.xlane.f32.xlu1 %v643_v55  ;;  %v640_v56 = vsel %vm519_vm4, %v1054_v54, 0.0 }
 0x2c7   : > { %641 = vadd.xlane.f32.xlu2 %v640_v56 }
 0x339   : > { %v645_v59 = vpop.xlane.xlu1 %644 }
 0x33a   : > { %v642_v60 = vpop.xlane.xlu2 %641  ;;  %1055 = vrcp.f32 %v645_v59 }
 0x33b   : > { %1057 = vrcp.f32 %v642_v60 }
 0x33c   : > { %v679_v61 = vpop.f32.mrf.mxu2 }
 0x340   : > { %v1056_v62 = vpop.eup %1055 }
 0x341   : > { %v1058_v63 = vpop.eup %1057  ;;  %v649_v0 = vmul.f32 %v1056_v62, %v1052_v53 }
 0x342   : > { %v648_v1 = vmul.f32 %v1058_v63, %v1054_v54 }
 0x343   : > { %v656_v2 = vpack.c.bf16 %v649_v0, %v649_v0 }
 0x344   : > { %v655_v3 = vpack.c.bf16 %v648_v1, %v648_v1  ;;  %v681_v4 = vpop.f32.mrf.mxu2 }
 0x345   : > { %658 = vst.msk [vmem:[%s1224_s17 + $0x4] sm:$0xf] %vm652_vm8, %v656_v2  ;;  %v686_v5 = vpack.c.bf16 %v681_v4, %v679_v61 }
 0x346   : > { %657 = vst.msk [vmem:[%s1224_s17] sm:$0xf] %vm652_vm8, %v655_v3 }
 0x347   : > { %969 = vmatmul.msk.bf16.vlgmr.msra.gmra.mxu3 %vm496_vm3, %v686_v5 }
 0x3ca   : > { %v704_v7 = vpop.f32.mrf.mxu3 }
 0x3cb   : > { %v709_v8 = vadd.f32 %v704_v7, %v684_v6 }
 0x3cd   : > { %711 = vst.msk [vmem:[#allocation3] sm:$0xff] %vm474_vm2, %v709_v8 }
 0x3d1   : > { %716 = sbr.rel (%p970_p9) target bundleno = 990 (0x3de), region = 52 }
 0x3d2   : > { %v706_v10 = vpop.f32.mrf.mxu3 }
 0x3d3   : > { %v710_v11 = vadd.f32 %v706_v10, %v685_v9 }
 0x3d5   : > { %712 = vst.msk [vmem:[#allocation3 + $0x8] sm:$0xff] %vm474_vm2, %v710_v11 }
 0x3d6   : > { %v717_v12 = vld [vmem:[#allocation3] sm:$0xff] }
 0x3d7   : > { %719 = vst.msk [vmem:[%s1209_s7] sm:$0xff] %vm474_vm2, %v717_v12 }
 0x3dc   : > { %v718_v13 = vld [vmem:[#allocation3 + $0x8] sm:$0xff] }
 0x3dd   : > { %720 = vst.msk [vmem:[%s1209_s7 + $0x8] sm:$0xff] %vm474_vm2, %v718_v13 }
 0x3de PF: > { %s21_s6 = sadd.s32 1, %s1097_s6   ;;  %s1314_s14 = sld [smem:[#allocation4_spill]] }
 0x3df   : > { %p18_p10 = scmp.ge.s32.totalorder %s21_s6, 10   ;;  %s1315_s21 = sld [smem:[#allocation5_spill]] }
 0x3e0   : > { %s1316_s16 = sld [smem:[#allocation6_spill]]  ;;  %s1317_s13 = smov %s1089_s15 }
 0x3e1   :  { %20 = sbr.rel (!%p18_p10) target bundleno = 3 (0x3), region = 115 }
 0x3e5   : > { %s1318_s15 = smov %s1315_s21 }

// kernel: anomaly_transformer_forward.11
= control target key start
LH: loop header
LB: loop body
LE: loop exit
PB: predicated region body
PF: predicated region fallthrough
CT: control target
= control target key end

     0   :  { %vm25_vm0 = vcmask 261120   ;;  %v221_v8 = vmov 32.0   ;;  %vm184_vm14 = vcmask 64512   ;;  %s321_s0 = inlined_call_operand.vmem [shape: f32[32,32], index: 0, kind: input, shape index: {}]   ;;  %s322_s1 = inlined_call_operand.vmem [shape: f32[1,32], index: 1, kind: input, shape index: {}]   ;;  %s323_s2 = inlined_call_operand.vmem [shape: f32[1,32], index: 2, kind: input, shape index: {}]   ;;  %s324_s4 = inlined_call_operand.vmem [shape: f32[1,8], index: 4, kind: input, shape index: {}]   ;;  %s325_s3 = inlined_call_operand.vmem [shape: bf16[32,8], index: 3, kind: input, shape index: {}]   ;;  %s326_s5 = inlined_call_operand.vmem [shape: f32[32,8], index: 5, kind: output, shape index: {}]  }
   0x1   :  { %v23_v0 = vld [vmem:[%s321_s0 + $0x10] sm:$0xff]  ;;  %v21_v1 = vld [vmem:[%s321_s0] sm:$0xff]  ;;  %v24_v4 = vld [vmem:[%s321_s0 + $0x18] sm:$0xff]  ;;  %211 = vrcp.f32 %v221_v8 }
   0x2   :  { %v32_v2 = vsel %vm25_vm0, %v23_v0, 0.0  ;;  %v26_v3 = vsel %vm25_vm0, %v21_v1, 0.0  ;;  %v22_v5 = vld [vmem:[%s321_s0 + $0x8] sm:$0xff]  ;;  %v35_v6 = vsel %vm25_vm0, %v24_v4, 0.0  ;;  %v203_v40 = vld [vmem:[%s325_s3] sm:$0xff] }
   0x3   :  { %33 = vadd.xlane.f32.xlu1 %v32_v2  ;;  %27 = vadd.xlane.f32.xlu0 %v26_v3  ;;  %v29_v7 = vsel %vm25_vm0, %v22_v5, 0.0  ;;  %v204_v35 = vld [vmem:[%s325_s3 + $0x8] sm:$0xff] }
   0x4   :  { %171 = vmatpush.bf16.msra.mxu0 %v204_v35  ;;  %205 = vmatpush.bf16.msra.mxu1 %v204_v35 }
   0x7   :  { %v212_v9 = vpop.eup %211 }
   0x8   :  { %v39_v10 = vmul.f32 32.0, %v212_v9  ;;  %vm43_vm1 = vweird.f32 %v212_v9  ;;  %172 = vmatpush.bf16.msra.mxu0 %v203_v40  ;;  %206 = vmatpush.bf16.msra.mxu1 %v203_v40 }
   0xa   :  { %v40_v11 = vsub.f32 1.0, %v39_v10  ;;  %v208_v10 = vld [vmem:[%s322_s1] ss:$0 sm:$0xff] }
   0xb   :  { %36 = vadd.xlane.f32.xlu1 %v35_v6  ;;  %30 = vadd.xlane.f32.xlu0 %v29_v7 }
   0xc   :  { %v41_v12 = vmul.f32 %v212_v9, %v40_v11 }
   0xe   :  { %v42_v13 = vadd.f32 %v212_v9, %v41_v12 }
  0x10   :  { %v44_v14 = vsel %vm43_vm1, %v212_v9, %v42_v13 }
  0x76   :  { %v34_v15 = vpop.xlane.xlu1 %33  ;;  %v28_v16 = vpop.xlane.xlu0 %27 }
  0x77   :  { %v47_v17 = vmul.f32 %v44_v14, %v34_v15  ;;  %v45_v18 = vmul.f32 %v44_v14, %v28_v16 }
  0x79   :  { %v268_v19 = vsub.f32 %v23_v0, %v47_v17  ;;  %v270_v20 = vsub.f32 %v21_v1, %v45_v18  ;;  %v209_v17 = vld [vmem:[%s323_s2] ss:$0 sm:$0xff] }
  0x7b   :  { %v55_v21 = vmul.f32 %v268_v19, %v268_v19  ;;  %v53_v22 = vmul.f32 %v270_v20, %v270_v20 }
  0x7d   :  { %v63_v23 = vsel %vm25_vm0, %v55_v21, 0.0  ;;  %v57_v24 = vsel %vm25_vm0, %v53_v22, 0.0 }
  0x7e   :  { %v37_v25 = vpop.xlane.xlu1 %36  ;;  %64 = vadd.xlane.f32.xlu0 %v63_v23  ;;  %58 = vadd.xlane.f32.xlu2 %v57_v24  ;;  %v31_v26 = vpop.xlane.xlu0 %30 }
  0x7f   :  { %v48_v27 = vmul.f32 %v44_v14, %v37_v25  ;;  %v46_v28 = vmul.f32 %v44_v14, %v31_v26 }
  0x81   :  { %v278_v29 = vsub.f32 %v24_v4, %v48_v27  ;;  %v280_v30 = vsub.f32 %v22_v5, %v46_v28 }
  0x83   :  { %v56_v31 = vmul.f32 %v278_v29, %v278_v29  ;;  %v54_v32 = vmul.f32 %v280_v30, %v280_v30 }
  0x85   :  { %v66_v33 = vsel %vm25_vm0, %v56_v31, 0.0  ;;  %v60_v34 = vsel %vm25_vm0, %v54_v32, 0.0 }
  0x86   :  { %67 = vadd.xlane.f32.xlu1 %v66_v33  ;;  %61 = vadd.xlane.f32.xlu2 %v60_v34 }
  0xf1   :  { %v59_v36 = vpop.xlane.xlu2 %58  ;;  %v65_v37 = vpop.xlane.xlu0 %64 }
  0xf2   :  { %v69_v38 = vmul.f32 %v59_v36, %v44_v14  ;;  %v71_v39 = vmul.f32 %v65_v37, %v44_v14 }
  0xf4   :  { %v73_v41 = vadd.f32 1e-05, %v69_v38  ;;  %v75_v42 = vadd.f32 1e-05, %v71_v39 }
  0xf6   :  { %213 = vrsqrt.f32 %v73_v41  ;;  %vm103_vm4 = vweird.f32 %v75_v42  ;;  %vm83_vm5 = vweird.f32 %v73_v41 }
  0xf7   :  { %215 = vrsqrt.f32 %v75_v42 }
  0xf9   :  { %v68_v43 = vpop.xlane.xlu1 %67  ;;  %v62_v44 = vpop.xlane.xlu2 %61 }
  0xfa   :  { %v72_v45 = vmul.f32 %v68_v43, %v44_v14  ;;  %v70_v46 = vmul.f32 %v62_v44, %v44_v14 }
  0xfc   :  { %v214_v47 = vpop.eup %213  ;;  %v76_v48 = vadd.f32 1e-05, %v72_v45  ;;  %v74_v49 = vadd.f32 1e-05, %v70_v46 }
  0xfd   :  { %v216_v50 = vpop.eup %215  ;;  %v78_v51 = vmul.f32 %v214_v47, %v73_v41  ;;  %vm84_vm3 = vweird.f32 %v214_v47 }
  0xfe   :  { %v98_v52 = vmul.f32 %v216_v50, %v75_v42  ;;  %217 = vrsqrt.f32 %v76_v48  ;;  %vm104_vm2 = vweird.f32 %v216_v50  ;;  %vm85_vm7 = vmor %vm83_vm5, %vm84_vm3  ;;  %vm113_vm10 = vweird.f32 %v76_v48 }
  0xff   :  { %v79_v53 = vmul.f32 %v214_v47, %v78_v51  ;;  %219 = vrsqrt.f32 %v74_v49  ;;  %vm105_vm6 = vmor %vm103_vm4, %vm104_vm2  ;;  %vm93_vm12 = vweird.f32 %v74_v49 }
 0x100   :  { %v99_v54 = vmul.f32 %v216_v50, %v98_v52 }
 0x101   :  { %v80_v55 = vmul.f32 0.5, %v79_v53 }
 0x102   :  { %v100_v56 = vmul.f32 0.5, %v99_v54 }
 0x103   :  { %v81_v57 = vsub.f32 1.5, %v80_v55 }
 0x104   :  { %v218_v58 = vpop.eup %217  ;;  %v101_v59 = vsub.f32 1.5, %v100_v56 }
 0x105   :  { %v220_v60 = vpop.eup %219  ;;  %v108_v61 = vmul.f32 %v218_v58, %v76_v48  ;;  %v82_v62 = vmul.f32 %v214_v47, %v81_v57  ;;  %vm114_vm8 = vweird.f32 %v218_v58 }
 0x106   :  { %v102_v63 = vmul.f32 %v216_v50, %v101_v59  ;;  %v88_v0 = vmul.f32 %v220_v60, %v74_v49  ;;  %vm94_vm9 = vweird.f32 %v220_v60  ;;  %vm115_vm11 = vmor %vm113_vm10, %vm114_vm8 }
 0x107   :  { %v109_v1 = vmul.f32 %v218_v58, %v108_v61  ;;  %v86_v5 = vsel %vm85_vm7, %v214_v47, %v82_v62  ;;  %vm95_vm13 = vmor %vm93_vm12, %vm94_vm9 }
 0x108   :  { %v89_v2 = vmul.f32 %v220_v60, %v88_v0  ;;  %v106_v3 = vsel %vm105_vm6, %v216_v50, %v102_v63  ;;  %v117_v11 = vmul.f32 %v86_v5, %v270_v20 }
 0x109   :  { %v110_v4 = vmul.f32 0.5, %v109_v1  ;;  %v119_v8 = vmul.f32 %v106_v3, %v268_v19 }
 0x10a   :  { %v90_v6 = vmul.f32 0.5, %v89_v2  ;;  %v125_v21 = vmul.f32 %v208_v10, %v117_v11 }
 0x10b   :  { %v111_v7 = vsub.f32 1.5, %v110_v4  ;;  %v127_v18 = vmul.f32 %v208_v10, %v119_v8 }
 0x10c   :  { %v91_v9 = vsub.f32 1.5, %v90_v6  ;;  %v133_v25 = vadd.f32 %v209_v17, %v125_v21 }
 0x10d   :  { %v112_v12 = vmul.f32 %v218_v58, %v111_v7  ;;  %v135_v23 = vadd.f32 %v209_v17, %v127_v18 }
 0x10e   :  { %v92_v13 = vmul.f32 %v220_v60, %v91_v9 }
 0x10f   :  { %v116_v14 = vsel %vm115_vm11, %v218_v58, %v112_v12 }
 0x110   :  { %v120_v15 = vmul.f32 %v116_v14, %v278_v29  ;;  %v96_v16 = vsel %vm95_vm13, %v220_v60, %v92_v13  ;;  %v210_v29 = vld [vmem:[%s324_s4] ss:$0 sm:$0xff] }
 0x111   :  { %v118_v19 = vmul.f32 %v96_v16, %v280_v30 }
 0x112   :  { %v128_v22 = vmul.f32 %v208_v10, %v120_v15 }
 0x113   :  { %v126_v20 = vmul.f32 %v208_v10, %v118_v19 }
 0x114   :  { %v136_v24 = vadd.f32 %v209_v17, %v128_v22 }
 0x115   :  { %v134_v26 = vadd.f32 %v209_v17, %v126_v20 }
 0x116   :  { %v138_v27 = vpack.c.bf16 %v136_v24, %v135_v23 }
 0x117   :  { %v137_v28 = vpack.c.bf16 %v134_v26, %v133_v25 }
 0x118   :  { %202 = vmatmul.msk.bf16.vlgmr.msra.gmra.mxu1 %vm25_vm0, %v138_v27 }
 0x119   :  { %201 = vmatmul.msk.bf16.vlgmr.msra.gmra.mxu0 %vm25_vm0, %v137_v28 }
 0x195   :  { %v179_v31 = vpop.f32.mrf.mxu1 }
 0x196   :  { %v174_v30 = vpop.f32.mrf.mxu0  ;;  %v180_v32 = vadd.f32 %v210_v29, %v179_v31 }
 0x197   :  { %v175_v33 = vadd.f32 %v210_v29, %v174_v30 }
 0x198   :  { %187 = vst.msk [vmem:[%s326_s5 + $0x10] sm:$0xff] %vm184_vm14, %v180_v32 }
 0x199   :  { %185 = vst.msk [vmem:[%s326_s5] sm:$0xff] %vm184_vm14, %v175_v33 }
 0x19d   :  { %v181_v34 = vpop.f32.mrf.mxu1 }
 0x19e   :  { %v176_v35 = vpop.f32.mrf.mxu0  ;;  %v182_v36 = vadd.f32 %v210_v29, %v181_v34 }
 0x19f   :  { %v177_v37 = vadd.f32 %v210_v29, %v176_v35 }
 0x1a0   :  { %188 = vst.msk [vmem:[%s326_s5 + $0x18] sm:$0xff] %vm184_vm14, %v182_v36 }
 0x1a1   :  { %186 = vst.msk [vmem:[%s326_s5 + $0x8] sm:$0xff] %vm184_vm14, %v177_v37 }

</bundles_post_ra>
